<compile_context>
chip_gen: v7x
topology: tpu7x:2x2x1
jax: 0.10.0
libtpu: 0.0.40
codegen_flags: <defaults>
</compile_context>

<pallas_src>
import jax
import jax.numpy as jnp
from jax.experimental import pallas as pl
from jax.experimental.pallas import tpu as pltpu

VMEM_SPEC = pl.BlockSpec(memory_space=pltpu.MemorySpace.VMEM)


def _round_up(n, m):
    return ((n + m - 1) // m) * m


# ----------------------------------------------------------------------------
# One-time kernel: decoder sigmatrix chains + channel normalisation
# (batch-independent -> run once per weight set, NOT per forward step)
# ----------------------------------------------------------------------------
def _sigmatrix_kernel(dw0, dw1, dw2, dw3, dw4,        # (C, in_l, out_l) f32
                      recon_w_ref,                    # (out_dim, C*in_dim) f32
                      norm_sig_ref):                  # (C, out_dim, in_dim) f32
    C = dw0.shape[0]
    sigs = []
    for c in range(C):                                # C tiny -> static unroll
        w01 = jnp.dot(dw0[c], dw1[c], preferred_element_type=jnp.float32)
        w02 = jnp.dot(w01, dw2[c], preferred_element_type=jnp.float32)
        w03 = jnp.dot(w02, dw3[c], preferred_element_type=jnp.float32)
        w04 = jnp.dot(w03, dw4[c], preferred_element_type=jnp.float32)
        sigs.append(jnp.maximum(w04, 0.0))            # ReLU -> sigmatrix_c

    # Pre-concatenated recon weight slab: recon = z @ [sig_0 | sig_1 | ...]
    recon_w_ref[...] = jnp.concatenate(sigs, axis=-1)

    # Channel normalisation (matches torch signnorm: no eps guard).
    denom = sigs[0]
    for c in range(1, C):
        denom = denom + sigs[c]
    for c in range(C):
        norm_sig_ref[c] = sigs[c] / denom


def precompute_sigmatrices(dw):
    """dw: tuple of 5 stacked (C, in_l, out_l) f32 decoder weights."""
    C, out_dim, _ = dw[0].shape
    in_dim = dw[-1].shape[-1]
    return pl.pallas_call(
        _sigmatrix_kernel,
        out_shape=(jax.ShapeDtypeStruct((out_dim, C * in_dim), jnp.float32),
                   jax.ShapeDtypeStruct((C, out_dim, in_dim), jnp.float32)),
        in_specs=[VMEM_SPEC] * len(dw),
        out_specs=(VMEM_SPEC, VMEM_SPEC),
        compiler_params=pltpu.CompilerParams(vmem_limit_bytes=32 << 20),
    )(*dw)


# ----------------------------------------------------------------------------
# Per-step fused kernel: encoders + compressor softmax + recon matmul
# ----------------------------------------------------------------------------
def _fused_forward_kernel(x_ref,                          # (C, B, in_dim)        f32
                          ew1, ew2, ew3, ew4, ew5, ew6,   # (C, in_l, out_l)      bf16
                          eb_ref,                         # (C, 1, bias_total)    f32
                          cw_ref,                         # (C, out_dim, out_dim) f32
                          cb_ref,                         # (1, out_dim)          f32
                          rw_ref,                         # (out_dim, C*in_dim)   f32
                          recon_ref,                      # (B, C*in_dim)         f32
                          z_ref):                         # (B, out_dim)          f32
    C = x_ref.shape[0]
    enc_ws = (ew1, ew2, ew3, ew4, ew5, ew6)

    # Bias-packing offsets (128-lane aligned). Must mirror pack_params().
    offs, total = [], 0
    for w in enc_ws:
        offs.append(total)
        total += _round_up(w.shape[-1], 128)

    # ----- per-channel encoder MLPs fused with the compressor -----------------
    # softmax(interleaved_flat @ W + b) == softmax(sum_c enc_c @ W[c::C] + b);
    # W is pre-sliced per channel in pack_params(), so no interleave is built.
    logits = cb_ref[...]                                  # (1, out_dim), broadcasts
    for c in range(C):                                    # static unroll
        h = x_ref[c]                                      # (B, in_dim) f32
        biases = eb_ref[c]                                # (1, bias_total) f32
        for li, w in enumerate(enc_ws):
            n = w.shape[-1]
            y = jnp.dot(h.astype(w.dtype), w[c],          # bf16 MXU, f32 accumulate
                        preferred_element_type=jnp.float32)
            y = y + biases[:, offs[li]:offs[li] + n]
            if li < len(enc_ws) - 1:
                h = jnp.where(y > 0.0, y, jnp.expm1(y))   # CELU(alpha=1), f32
            else:
                h = y                                     # final Linear, no CELU
        logits = logits + jnp.dot(h, cw_ref[c],
                                  preferred_element_type=jnp.float32)

    m = jnp.max(logits, axis=-1, keepdims=True)           # softmax(dim=1), f32
    e = jnp.exp(logits - m)
    z = e / jnp.sum(e, axis=-1, keepdims=True)
    z_ref[...] = z

    # Batched recon for all channels: one (B, out_dim) @ (out_dim, C*in_dim)
    # matmul against the precomputed UNnormalised sigmatrix slab.
    recon_ref[...] = jnp.dot(z, rw_ref[...], preferred_element_type=jnp.float32)


# ----------------------------------------------------------------------------
# Wrapper: one pallas_call for the per-step forward
# ----------------------------------------------------------------------------
def baseline_forward(x, packed):
    """x: (B, input_dim, C) f32 -> (stacked_recon, compressed_latent, stacked_sig)."""
    B, in_dim, C = x.shape
    out_dim = packed["cb"].shape[-1]

    # Tiny layout plumbing so every per-channel block in the kernel is lane-dense.
    x_cbf = jnp.transpose(x, (2, 0, 1))                   # (C, B, in_dim)

    operands = (x_cbf, *packed["ew"], packed["eb"], packed["cw"], packed["cb"],
                packed["recon_w"])

    recon_slab, z = pl.pallas_call(
        _fused_forward_kernel,
        out_shape=(
            jax.ShapeDtypeStruct((B, C * in_dim), jnp.float32),     # recon slab
            jax.ShapeDtypeStruct((B, out_dim), jnp.float32),        # latent
        ),
        in_specs=[VMEM_SPEC] * len(operands),
        out_specs=(VMEM_SPEC, VMEM_SPEC),
        compiler_params=pltpu.CompilerParams(vmem_limit_bytes=32 << 20),
    )(*operands)

    # Back to the PyTorch output layouts (KB-sized tensors; negligible).
    stacked_recon = jnp.transpose(recon_slab.reshape(B, C, in_dim), (0, 2, 1))
    stacked_sig = packed["sig"]                           # (out_dim, in_dim, C), precomputed
    return stacked_recon, z, stacked_sig


# ----------------------------------------------------------------------------
# Parameter init (deterministic, PyTorch-Linear-like uniform(+/- 1/sqrt(fan_in)))
# Stored as (in, out) == torch_weight.T so kernels compute x @ W directly.
# ----------------------------------------------------------------------------
def _linear_params(key, fan_in, fan_out, bias=True):
    kw, kb = jax.random.split(key)
    bound = 1.0 / float(fan_in) ** 0.5
    w = jax.random.uniform(kw, (fan_in, fan_out), jnp.float32, -bound, bound)
    if not bias:
        return w
    b = jax.random.uniform(kb, (1, fan_out), jnp.float32, -bound, bound)
    return w, b


def init_params(key, input_dim, channels, output_dim):
    params = {"enc": [], "dec": []}
    enc_dims = [input_dim, 1024, 512, 256, 128, 64, output_dim]
    dec_dims = [output_dim, 64, 128, 256, 512, input_dim]
    for _ in range(channels):
        layers = []
        for i in range(len(enc_dims) - 1):
            key, sub = jax.random.split(key)
            layers.append(_linear_params(sub, enc_dims[i], enc_dims[i + 1]))
        params["enc"].append(layers)
    key, sub = jax.random.split(key)
    params["comp_w"], params["comp_b"] = _linear_params(
        sub, output_dim * channels, output_dim)
    for _ in range(channels):
        ws = []
        for i in range(len(dec_dims) - 1):
            key, sub = jax.random.split(key)
            ws.append(_linear_params(sub, dec_dims[i], dec_dims[i + 1],
                                     bias=False))
        params["dec"].append(ws)
    return params


def pack_params(params, channels):
    """Stack per-channel weights, cast encoder weights to bf16, pack biases,
    pre-slice the compressor weight per channel (interleave folded in) and
    precompute the batch-independent decoder sigmatrices once."""
    enc = params["enc"]
    n_enc = len(enc[0])
    ew = tuple(
        jnp.stack([enc[c][l][0] for c in range(channels)], axis=0)
        .astype(jnp.bfloat16)
        for l in range(n_enc))

    dims = [enc[0][l][0].shape[1] for l in range(n_enc)]
    offs, total = [], 0
    for d in dims:
        offs.append(total)
        total += _round_up(d, 128)
    eb = jnp.zeros((channels, 1, total), jnp.float32)
    for c in range(channels):
        for l, d in enumerate(dims):
            eb = eb.at[c, :, offs[l]:offs[l] + d].set(enc[c][l][1])

    # softmax(interleaved_flat @ W + b) == softmax(sum_c enc_c @ W[c::C] + b)
    W = params["comp_w"]
    cw = jnp.stack([W[c::channels, :] for c in range(channels)], axis=0)
    cb = params["comp_b"]

    # Decoder weights: run the one-time sigmatrix kernel, keep only the tiny
    # (out_dim, C*in_dim) recon slab and the normalised (out_dim, in_dim, C)
    # sig output; the 2.3 MB of raw dw never touches the per-step kernel.
    n_dec = len(params["dec"][0])
    dw = tuple(
        jnp.stack([params["dec"][c][l] for c in range(channels)], axis=0)
        for l in range(n_dec))
    recon_w, norm_sig_cfirst = precompute_sigmatrices(dw)
    sig = jnp.transpose(norm_sig_cfirst, (1, 2, 0))       # (out_dim, in_dim, C)

    return {"ew": ew, "eb": eb, "cw": cw, "cb": cb,
            "recon_w": recon_w, "sig": sig}


# ----------------------------------------------------------------------------
if __name__ == "__main__":
    INPUT_DIM, CHANNELS, OUTPUT_DIM, BATCH = 32, 3, 16, 4

    key = jax.random.PRNGKey(0)
    k_param, k_x = jax.random.split(key)
    params = init_params(k_param, INPUT_DIM, CHANNELS, OUTPUT_DIM)
    packed = pack_params(params, CHANNELS)
    x = jax.random.normal(k_x, (BATCH, INPUT_DIM, CHANNELS), jnp.float32)

    fwd = jax.jit(baseline_forward)
    stacked_recon, compressed_latent, stacked_sig = fwd(x, packed)
    jax.block_until_ready((stacked_recon, compressed_latent, stacked_sig))

    assert stacked_recon.shape == (BATCH, INPUT_DIM, CHANNELS)
    assert compressed_latent.shape == (BATCH, OUTPUT_DIM)
    assert stacked_sig.shape == (OUTPUT_DIM, INPUT_DIM, CHANNELS)
    assert bool(jnp.all(jnp.isfinite(compressed_latent)))
    print("KERNEL_OK")
</pallas_src>

<mosaic_0001>
module attributes {stable_mosaic.version = 11 : i64} {
  func.func @_sigmatrix_kernel(%arg0: memref<3x16x64xf32, #tpu.memory_space<vmem>>, %arg1: memref<3x64x128xf32, #tpu.memory_space<vmem>>, %arg2: memref<3x128x256xf32, #tpu.memory_space<vmem>>, %arg3: memref<3x256x512xf32, #tpu.memory_space<vmem>>, %arg4: memref<3x512x32xf32, #tpu.memory_space<vmem>>, %arg5: memref<16x96xf32, #tpu.memory_space<vmem>>, %arg6: memref<3x16x32xf32, #tpu.memory_space<vmem>>) attributes {dimension_semantics = [], scalar_prefetch = 0 : i64, scratch_operands = 0 : i64, tpu.core_type = #tpu.core_type<tc>} {
    %c0 = arith.constant 0 : index
    %c0_0 = arith.constant 0 : index
    %c0_1 = arith.constant 0 : index
    %0 = vector.load %arg0[%c0, %c0_0, %c0_1] : memref<3x16x64xf32, #tpu.memory_space<vmem>>, vector<1x16x64xf32>
    %1 = vector.shape_cast %0 : vector<1x16x64xf32> to vector<16x64xf32>
    %c0_2 = arith.constant 0 : index
    %c0_3 = arith.constant 0 : index
    %c0_4 = arith.constant 0 : index
    %2 = vector.load %arg1[%c0_2, %c0_3, %c0_4] : memref<3x64x128xf32, #tpu.memory_space<vmem>>, vector<1x64x128xf32>
    %3 = vector.shape_cast %2 : vector<1x64x128xf32> to vector<64x128xf32>
    %cst = arith.constant dense<0.000000e+00> : vector<16x128xf32>
    %4 = tpu.matmul %1, %3, %cst {dimension_numbers = #tpu.dot_dimension_numbers<[1], [0], [0], [1], [0, 0, 1, 1], [], []>} : vector<16x64xf32>, vector<64x128xf32>, vector<16x128xf32> -> vector<16x128xf32>
    %c0_5 = arith.constant 0 : index
    %c0_6 = arith.constant 0 : index
    %c0_7 = arith.constant 0 : index
    %5 = vector.load %arg2[%c0_5, %c0_6, %c0_7] : memref<3x128x256xf32, #tpu.memory_space<vmem>>, vector<1x128x256xf32>
    %6 = vector.shape_cast %5 : vector<1x128x256xf32> to vector<128x256xf32>
    %cst_8 = arith.constant dense<0.000000e+00> : vector<16x256xf32>
    %7 = tpu.matmul %4, %6, %cst_8 {dimension_numbers = #tpu.dot_dimension_numbers<[1], [0], [0], [1], [0, 0, 1, 1], [], []>} : vector<16x128xf32>, vector<128x256xf32>, vector<16x256xf32> -> vector<16x256xf32>
    %c0_9 = arith.constant 0 : index
    %c0_10 = arith.constant 0 : index
    %c0_11 = arith.constant 0 : index
    %8 = vector.load %arg3[%c0_9, %c0_10, %c0_11] : memref<3x256x512xf32, #tpu.memory_space<vmem>>, vector<1x256x512xf32>
    %9 = vector.shape_cast %8 : vector<1x256x512xf32> to vector<256x512xf32>
    %cst_12 = arith.constant dense<0.000000e+00> : vector<16x512xf32>
    %10 = tpu.matmul %7, %9, %cst_12 {dimension_numbers = #tpu.dot_dimension_numbers<[1], [0], [0], [1], [0, 0, 1, 1], [], []>} : vector<16x256xf32>, vector<256x512xf32>, vector<16x512xf32> -> vector<16x512xf32>
    %c0_13 = arith.constant 0 : index
    %c0_14 = arith.constant 0 : index
    %c0_15 = arith.constant 0 : index
    %11 = vector.load %arg4[%c0_13, %c0_14, %c0_15] : memref<3x512x32xf32, #tpu.memory_space<vmem>>, vector<1x512x32xf32>
    %12 = vector.shape_cast %11 : vector<1x512x32xf32> to vector<512x32xf32>
    %cst_16 = arith.constant dense<0.000000e+00> : vector<16x32xf32>
    %13 = tpu.matmul %10, %12, %cst_16 {dimension_numbers = #tpu.dot_dimension_numbers<[1], [0], [0], [1], [0, 0, 1, 1], [], []>} : vector<16x512xf32>, vector<512x32xf32>, vector<16x32xf32> -> vector<16x32xf32>
    %cst_17 = arith.constant 0.000000e+00 : f32
    %14 = vector.broadcast %cst_17 : f32 to vector<16x32xf32>
    %15 = arith.maximumf %13, %14 : vector<16x32xf32>
    %c1 = arith.constant 1 : index
    %c0_18 = arith.constant 0 : index
    %c0_19 = arith.constant 0 : index
    %16 = vector.load %arg0[%c1, %c0_18, %c0_19] : memref<3x16x64xf32, #tpu.memory_space<vmem>>, vector<1x16x64xf32>
    %17 = vector.shape_cast %16 : vector<1x16x64xf32> to vector<16x64xf32>
    %c1_20 = arith.constant 1 : index
    %c0_21 = arith.constant 0 : index
    %c0_22 = arith.constant 0 : index
    %18 = vector.load %arg1[%c1_20, %c0_21, %c0_22] : memref<3x64x128xf32, #tpu.memory_space<vmem>>, vector<1x64x128xf32>
    %19 = vector.shape_cast %18 : vector<1x64x128xf32> to vector<64x128xf32>
    %cst_23 = arith.constant dense<0.000000e+00> : vector<16x128xf32>
    %20 = tpu.matmul %17, %19, %cst_23 {dimension_numbers = #tpu.dot_dimension_numbers<[1], [0], [0], [1], [0, 0, 1, 1], [], []>} : vector<16x64xf32>, vector<64x128xf32>, vector<16x128xf32> -> vector<16x128xf32>
    %c1_24 = arith.constant 1 : index
    %c0_25 = arith.constant 0 : index
    %c0_26 = arith.constant 0 : index
    %21 = vector.load %arg2[%c1_24, %c0_25, %c0_26] : memref<3x128x256xf32, #tpu.memory_space<vmem>>, vector<1x128x256xf32>
    %22 = vector.shape_cast %21 : vector<1x128x256xf32> to vector<128x256xf32>
    %cst_27 = arith.constant dense<0.000000e+00> : vector<16x256xf32>
    %23 = tpu.matmul %20, %22, %cst_27 {dimension_numbers = #tpu.dot_dimension_numbers<[1], [0], [0], [1], [0, 0, 1, 1], [], []>} : vector<16x128xf32>, vector<128x256xf32>, vector<16x256xf32> -> vector<16x256xf32>
    %c1_28 = arith.constant 1 : index
    %c0_29 = arith.constant 0 : index
    %c0_30 = arith.constant 0 : index
    %24 = vector.load %arg3[%c1_28, %c0_29, %c0_30] : memref<3x256x512xf32, #tpu.memory_space<vmem>>, vector<1x256x512xf32>
    %25 = vector.shape_cast %24 : vector<1x256x512xf32> to vector<256x512xf32>
    %cst_31 = arith.constant dense<0.000000e+00> : vector<16x512xf32>
    %26 = tpu.matmul %23, %25, %cst_31 {dimension_numbers = #tpu.dot_dimension_numbers<[1], [0], [0], [1], [0, 0, 1, 1], [], []>} : vector<16x256xf32>, vector<256x512xf32>, vector<16x512xf32> -> vector<16x512xf32>
    %c1_32 = arith.constant 1 : index
    %c0_33 = arith.constant 0 : index
    %c0_34 = arith.constant 0 : index
    %27 = vector.load %arg4[%c1_32, %c0_33, %c0_34] : memref<3x512x32xf32, #tpu.memory_space<vmem>>, vector<1x512x32xf32>
    %28 = vector.shape_cast %27 : vector<1x512x32xf32> to vector<512x32xf32>
    %cst_35 = arith.constant dense<0.000000e+00> : vector<16x32xf32>
    %29 = tpu.matmul %26, %28, %cst_35 {dimension_numbers = #tpu.dot_dimension_numbers<[1], [0], [0], [1], [0, 0, 1, 1], [], []>} : vector<16x512xf32>, vector<512x32xf32>, vector<16x32xf32> -> vector<16x32xf32>
    %cst_36 = arith.constant 0.000000e+00 : f32
    %30 = vector.broadcast %cst_36 : f32 to vector<16x32xf32>
    %31 = arith.maximumf %29, %30 : vector<16x32xf32>
    %c2 = arith.constant 2 : index
    %c0_37 = arith.constant 0 : index
    %c0_38 = arith.constant 0 : index
    %32 = vector.load %arg0[%c2, %c0_37, %c0_38] : memref<3x16x64xf32, #tpu.memory_space<vmem>>, vector<1x16x64xf32>
    %33 = vector.shape_cast %32 : vector<1x16x64xf32> to vector<16x64xf32>
    %c2_39 = arith.constant 2 : index
    %c0_40 = arith.constant 0 : index
    %c0_41 = arith.constant 0 : index
    %34 = vector.load %arg1[%c2_39, %c0_40, %c0_41] : memref<3x64x128xf32, #tpu.memory_space<vmem>>, vector<1x64x128xf32>
    %35 = vector.shape_cast %34 : vector<1x64x128xf32> to vector<64x128xf32>
    %cst_42 = arith.constant dense<0.000000e+00> : vector<16x128xf32>
    %36 = tpu.matmul %33, %35, %cst_42 {dimension_numbers = #tpu.dot_dimension_numbers<[1], [0], [0], [1], [0, 0, 1, 1], [], []>} : vector<16x64xf32>, vector<64x128xf32>, vector<16x128xf32> -> vector<16x128xf32>
    %c2_43 = arith.constant 2 : index
    %c0_44 = arith.constant 0 : index
    %c0_45 = arith.constant 0 : index
    %37 = vector.load %arg2[%c2_43, %c0_44, %c0_45] : memref<3x128x256xf32, #tpu.memory_space<vmem>>, vector<1x128x256xf32>
    %38 = vector.shape_cast %37 : vector<1x128x256xf32> to vector<128x256xf32>
    %cst_46 = arith.constant dense<0.000000e+00> : vector<16x256xf32>
    %39 = tpu.matmul %36, %38, %cst_46 {dimension_numbers = #tpu.dot_dimension_numbers<[1], [0], [0], [1], [0, 0, 1, 1], [], []>} : vector<16x128xf32>, vector<128x256xf32>, vector<16x256xf32> -> vector<16x256xf32>
    %c2_47 = arith.constant 2 : index
    %c0_48 = arith.constant 0 : index
    %c0_49 = arith.constant 0 : index
    %40 = vector.load %arg3[%c2_47, %c0_48, %c0_49] : memref<3x256x512xf32, #tpu.memory_space<vmem>>, vector<1x256x512xf32>
    %41 = vector.shape_cast %40 : vector<1x256x512xf32> to vector<256x512xf32>
    %cst_50 = arith.constant dense<0.000000e+00> : vector<16x512xf32>
    %42 = tpu.matmul %39, %41, %cst_50 {dimension_numbers = #tpu.dot_dimension_numbers<[1], [0], [0], [1], [0, 0, 1, 1], [], []>} : vector<16x256xf32>, vector<256x512xf32>, vector<16x512xf32> -> vector<16x512xf32>
    %c2_51 = arith.constant 2 : index
    %c0_52 = arith.constant 0 : index
    %c0_53 = arith.constant 0 : index
    %43 = vector.load %arg4[%c2_51, %c0_52, %c0_53] : memref<3x512x32xf32, #tpu.memory_space<vmem>>, vector<1x512x32xf32>
    %44 = vector.shape_cast %43 : vector<1x512x32xf32> to vector<512x32xf32>
    %cst_54 = arith.constant dense<0.000000e+00> : vector<16x32xf32>
    %45 = tpu.matmul %42, %44, %cst_54 {dimension_numbers = #tpu.dot_dimension_numbers<[1], [0], [0], [1], [0, 0, 1, 1], [], []>} : vector<16x512xf32>, vector<512x32xf32>, vector<16x32xf32> -> vector<16x32xf32>
    %cst_55 = arith.constant 0.000000e+00 : f32
    %46 = vector.broadcast %cst_55 : f32 to vector<16x32xf32>
    %47 = arith.maximumf %45, %46 : vector<16x32xf32>
    %48 = tpu.concatenate %15, %31, %47 in 1 : vector<16x32xf32>, vector<16x32xf32>, vector<16x32xf32> -> vector<16x96xf32>
    %c0_56 = arith.constant 0 : index
    %c0_57 = arith.constant 0 : index
    %49 = vector.load %arg5[%c0_56, %c0_57] : memref<16x96xf32, #tpu.memory_space<vmem>>, vector<16x96xf32>
    tpu.vector_store %arg5[%c0_56, %c0_57], %48 {strides = array<i32>} : memref<16x96xf32, #tpu.memory_space<vmem>>, vector<16x96xf32>,
    %50 = arith.addf %15, %31 : vector<16x32xf32>
    %51 = arith.addf %50, %47 : vector<16x32xf32>
    %52 = arith.divf %15, %51 : vector<16x32xf32>
    %c0_58 = arith.constant 0 : index
    %c0_59 = arith.constant 0 : index
    %c0_60 = arith.constant 0 : index
    %53 = vector.load %arg6[%c0_58, %c0_59, %c0_60] : memref<3x16x32xf32, #tpu.memory_space<vmem>>, vector<1x16x32xf32>
    %54 = vector.shape_cast %53 : vector<1x16x32xf32> to vector<16x32xf32>
    %55 = vector.shape_cast %52 : vector<16x32xf32> to vector<1x16x32xf32>
    tpu.vector_store %arg6[%c0_58, %c0_59, %c0_60], %55 {strides = array<i32>} : memref<3x16x32xf32, #tpu.memory_space<vmem>>, vector<1x16x32xf32>,
    %56 = arith.divf %31, %51 : vector<16x32xf32>
    %c1_61 = arith.constant 1 : index
    %c0_62 = arith.constant 0 : index
    %c0_63 = arith.constant 0 : index
    %57 = vector.load %arg6[%c1_61, %c0_62, %c0_63] : memref<3x16x32xf32, #tpu.memory_space<vmem>>, vector<1x16x32xf32>
    %58 = vector.shape_cast %57 : vector<1x16x32xf32> to vector<16x32xf32>
    %59 = vector.shape_cast %56 : vector<16x32xf32> to vector<1x16x32xf32>
    tpu.vector_store %arg6[%c1_61, %c0_62, %c0_63], %59 {strides = array<i32>} : memref<3x16x32xf32, #tpu.memory_space<vmem>>, vector<1x16x32xf32>,
    %60 = arith.divf %47, %51 : vector<16x32xf32>
    %c2_64 = arith.constant 2 : index
    %c0_65 = arith.constant 0 : index
    %c0_66 = arith.constant 0 : index
    %61 = vector.load %arg6[%c2_64, %c0_65, %c0_66] : memref<3x16x32xf32, #tpu.memory_space<vmem>>, vector<1x16x32xf32>
    %62 = vector.shape_cast %61 : vector<1x16x32xf32> to vector<16x32xf32>
    %63 = vector.shape_cast %60 : vector<16x32xf32> to vector<1x16x32xf32>
    tpu.vector_store %arg6[%c2_64, %c0_65, %c0_66], %63 {strides = array<i32>} : memref<3x16x32xf32, #tpu.memory_space<vmem>>, vector<1x16x32xf32>,
    return
  }
}

</mosaic_0001>

<bundles_post_ra>
// kernel: tpu_custom_call.1
= control target key start
LH: loop header
LB: loop body
LE: loop exit
PB: predicated region body
PF: predicated region fallthrough
CT: control target
= control target key end

     0   :  { %12 = vsyncpa [#allocation3], 0  ;;  %s4349_s0 = inlined_call_operand.hbm [shape: f32[3,16,64], index: 0, kind: input, shape index: {}]   ;;  %s4350_s1 = inlined_call_operand.hbm [shape: f32[3,64,128], index: 1, kind: input, shape index: {}]   ;;  %s4351_s2 = inlined_call_operand.hbm [shape: f32[3,128,256], index: 2, kind: input, shape index: {}]   ;;  %s4352_s3 = inlined_call_operand.hbm [shape: f32[3,256,512], index: 3, kind: input, shape index: {}]   ;;  %s4353_s4 = inlined_call_operand.vmem [shape: f32[3,512,32], index: 4, kind: input, shape index: {}]   ;;  %s4354_s5 = inlined_call_operand.hbm [shape: f32[16,96], index: 5, kind: output, shape index: {0}]   ;;  %s4355_s6 = inlined_call_operand.hbm [shape: f32[3,16,32], index: 6, kind: output, shape index: {1}]  }
   0x1   :  { %13 = vsyncpa [#allocation6], 0 }
   0x2   :  { %14 = vsyncpa [#allocation9], 0 }
   0x3   :  { %15 = vsyncpa [#allocation4], 0 }
   0x4   :  { %16 = vsyncpa [#allocation12], 0  ;;  %s3592_s21 = smov [#allocation5]   ;;  %s3593_s23 = smov [#allocation2]  }
   0x5   :  { %s34_s22 = sshll.u32 %s3592_s21, 4  ;;  %s22_s24 = sshll.u32 %s3593_s23, 4  ;;  %s35_s22 = int_to_ptr.vmem [resolvable:$true] %s34_s22  ;;  %s3641_s24 = int_to_ptr.vmem [resolvable:$true] %s22_s24 }
   0x6   :  { %s3450_s27 = scalar_lea.hbm %s4350_s1, 3072 }
   0x7   :  { %p3451_p0 = scmp.ne.s32.totalorder %s4350_s1, %s3450_s27  ;;  %p3454_p1 = scmp.lt.u32.totalorder %s3450_s27, %s4350_s1 }
   0x9   :  { %p3456_p2 = pnand %p3454_p1, %p3451_p0 }
   0xb   :  { %3459 = shalt.err (!%p3456_p2)
}
   0xc   :  { %s3460_s8 = scalar_lea.vmem %s35_s22, 3072  ;;  %p3465_p4 = scmp.lt.s32.totalorder %s35_s22, %s35_s22 }
   0xd   :  { %p3461_p3 = scmp.ne.s32.totalorder %s35_s22, %s3460_s8  ;;  %p3466_p5 = scmp.lt.s32.totalorder %s3460_s8, %s3460_s8 }
   0xf   :  { %p3467_p6 = por %p3466_p5, %p3465_p4 }
  0x11   :  { %p3468_p7 = pnand %p3467_p6, %p3461_p3 }
  0x13   :  { %3471 = shalt.err (!%p3468_p7)
}
  0x14   :  { %s3594_s9 = smov 128   ;;  %s3595_s10 = smov 8  }
  0x15   :  { %40 = dma.hbm_to_vmem [thread:$0]  %s4350_s1, 3072, %s35_s22, [#allocation6], %s3594_s9, %s3594_s9, %s3595_s10  }
  0x16   :  { %s3472_s15 = scalar_lea.hbm %s4349_s0, 768 }
  0x17   :  { %p3473_p8 = scmp.ne.s32.totalorder %s4349_s0, %s3472_s15  ;;  %p3476_p9 = scmp.lt.u32.totalorder %s3472_s15, %s4349_s0 }
  0x19   :  { %p3478_p10 = pnand %p3476_p9, %p3473_p8 }
  0x1b   :  { %3481 = shalt.err (!%p3478_p10)
}
  0x1c   :  { %s3482_s20 = scalar_lea.vmem %s3641_s24, 768  ;;  %p3487_p12 = scmp.lt.s32.totalorder %s3641_s24, %s3641_s24 }
  0x1d   :  { %p3483_p11 = scmp.ne.s32.totalorder %s3641_s24, %s3482_s20  ;;  %p3488_p13 = scmp.lt.s32.totalorder %s3482_s20, %s3482_s20 }
  0x1f   :  { %p3489_p0 = por %p3488_p13, %p3487_p12 }
  0x21   :  { %p3490_p1 = pnand %p3489_p0, %p3483_p11 }
  0x23   :  { %3493 = shalt.err (!%p3490_p1)
}
  0x24   :  { %28 = dma.hbm_to_vmem [thread:$0]  %s4349_s0, 768, %s3641_s24, [#allocation3], %s3594_s9, %s3594_s9, %s3595_s10  }
  0x25   :  { %s3596_s22 = smov [#allocation7]   ;;  %s3494_s27 = scalar_lea.hbm %s4351_s2, 12288 }
  0x26   :  { %s46_s23 = sshll.u32 %s3596_s22, 4  ;;  %p3495_p2 = scmp.ne.s32.totalorder %s4351_s2, %s3494_s27  ;;  %s47_s23 = int_to_ptr.vmem [resolvable:$true] %s46_s23 }
  0x27   :  { %p3498_p3 = scmp.lt.u32.totalorder %s3494_s27, %s4351_s2 }
  0x29   :  { %p3500_p4 = pnand %p3498_p3, %p3495_p2 }
  0x2b   :  { %3503 = shalt.err (!%p3500_p4)
}
  0x2c   :  { %s3504_s8 = scalar_lea.vmem %s47_s23, 12288  ;;  %p3509_p6 = scmp.lt.s32.totalorder %s47_s23, %s47_s23 }
  0x2d   :  { %p3505_p5 = scmp.ne.s32.totalorder %s47_s23, %s3504_s8  ;;  %p3510_p7 = scmp.lt.s32.totalorder %s3504_s8, %s3504_s8 }
  0x2f   :  { %p3511_p8 = por %p3510_p7, %p3509_p6 }
  0x31   :  { %p3512_p9 = pnand %p3511_p8, %p3505_p5 }
  0x33   :  { %3515 = shalt.err (!%p3512_p9)
}
  0x34   :  { %s3597_s0 = smov 256   ;;  %s3598_s24 = smov 16  }
  0x35   :  { %52 = dma.hbm_to_vmem [thread:$0]  %s4351_s2, 12288, %s47_s23, [#allocation6], %s3597_s0, %s3597_s0, %s3598_s24  }
  0x36   :  { %s3599_s13 = smov [#allocation8]   ;;  %s3516_s17 = scalar_lea.hbm %s4352_s3, 49152 }
  0x37   :  { %s58_s14 = sshll.u32 %s3599_s13, 4  ;;  %p3517_p10 = scmp.ne.s32.totalorder %s4352_s3, %s3516_s17  ;;  %s59_s14 = int_to_ptr.vmem [resolvable:$true] %s58_s14 }
  0x38   :  { %p3520_p11 = scmp.lt.u32.totalorder %s3516_s17, %s4352_s3 }
  0x3a   :  { %p3522_p12 = pnand %p3520_p11, %p3517_p10 }
  0x3c   :  { %3525 = shalt.err (!%p3522_p12)
}
  0x3d   :  { %s3526_s21 = scalar_lea.vmem %s59_s14, 49152  ;;  %p3531_p0 = scmp.lt.s32.totalorder %s59_s14, %s59_s14 }
  0x3e   :  { %p3527_p13 = scmp.ne.s32.totalorder %s59_s14, %s3526_s21  ;;  %p3532_p1 = scmp.lt.s32.totalorder %s3526_s21, %s3526_s21 }
  0x40   :  { %p3533_p2 = por %p3532_p1, %p3531_p0 }
  0x42   :  { %p3534_p3 = pnand %p3533_p2, %p3527_p13 }
  0x44   :  { %3537 = shalt.err (!%p3534_p3)
}
  0x45   :  { %s3600_s2 = smov 512   ;;  %s3601_s22 = smov 32  }
  0x46   :  { %64 = dma.hbm_to_vmem [thread:$0]  %s4352_s3, 49152, %s59_s14, [#allocation9], %s3600_s2, %s3600_s2, %s3601_s22  }
  0x47   :  { %3582 = dma.done.wait [#allocation3], 768  }
  0x48   :  { %3583 = vsyncadd [#allocation3], 4294966528 }
  0x49   :  { %3584 = dma.done.wait [#allocation6], 15360  }
  0x4a   :  { %3585 = vsyncadd [#allocation6], 4294951936 }
  0x4b   :  { %3586 = dma.done.wait [#allocation9], 49152  }
  0x4c   :  { %3587 = vsyncadd [#allocation9], 4294918144  ;;  %v81_v0 = vld [vmem:[#allocation5] sm:$0xff]  ;;  %v82_v1 = vld [vmem:[#allocation5 + $0x8] sm:$0xff]  ;;  %vm89_vm0 = vcmask 523264   ;;  %v3602_v62 = vmov 0.0  }
  0x4d   :  { %v83_v2 = vld [vmem:[#allocation5 + $0x10] sm:$0xff]  ;;  %v2712_v3 = vpack.c.bf16 %v82_v1, %v81_v0  ;;  %v84_v4 = vld [vmem:[#allocation5 + $0x18] sm:$0xff]  ;;  %v85_v6 = vld [vmem:[#allocation5 + $0x20] sm:$0xff]  ;;  %267 = vmatprep.mubr.f32.mxu1 %v3602_v62  ;;  %vm2200_vm1 = vcmask 261120   ;;  %s3604_s29 = smov [#allocation11]  }
  0x4e   :  { %v2716_v5 = vpack.c.bf16 %v84_v4, %v83_v2  ;;  %v86_v7 = vld [vmem:[#allocation5 + $0x28] sm:$0xff]  ;;  %v79_v8 = vld [vmem:[#allocation2] sm:$0xff]  ;;  %v174_v10 = vld [vmem:[#allocation7 + $0x18] sm:$0xff]  ;;  %s2245_s30 = sshll.u32 %s3604_s29, 4  ;;  %s2246_s30 = int_to_ptr.vmem [resolvable:$true] %s2245_s30 }
  0x4f   :  { %2713 = vmatprep.subr.bf16.mxu0 %v2712_v3  ;;  %2671 = vmatprep.mubr.msk.f32.mxu0 %vm89_vm0, %v79_v8  ;;  %v172_v9 = vld [vmem:[#allocation7 + $0x8] sm:$0xff]  ;;  %v87_v11 = vld [vmem:[#allocation5 + $0x30] sm:$0xff]  ;;  %v171_v13 = vld [vmem:[#allocation7] sm:$0xff]  ;;  %v2720_v16 = vpack.c.bf16 %v86_v7, %v85_v6  ;;  %p3543_p5 = scmp.lt.s32.totalorder %s2246_s30, %s2246_s30 }
  0x50   :  { %2715 = vmatpush3.bf16.msra.mxu0 %v2712_v3  ;;  %v2728_v12 = vpack.c.bf16 %v174_v10, %v172_v9  ;;  %v173_v14 = vld [vmem:[#allocation7 + $0x10] sm:$0xff]  ;;  %v176_v15 = vld [vmem:[#allocation7 + $0x28] sm:$0xff]  ;;  %v178_v18 = vld [vmem:[#allocation7 + $0x38] sm:$0xff] }
  0x51   :  { %2717 = vmatprep.subr.bf16.mxu0 %v2716_v5  ;;  %v2730_v17 = vpack.c.bf16 %v173_v14, %v171_v13  ;;  %v175_v19 = vld [vmem:[#allocation7 + $0x20] sm:$0xff]  ;;  %v177_v20 = vld [vmem:[#allocation7 + $0x30] sm:$0xff]  ;;  %v88_v21 = vld [vmem:[#allocation5 + $0x38] sm:$0xff]  ;;  %v2732_v22 = vpack.c.bf16 %v178_v18, %v176_v15 }
  0x52   :  { %2729 = vmatprep.subr.bf16.mxu1 %v2728_v12  ;;  %v180_v23 = vld [vmem:[#allocation7 + $0x48] sm:$0xff]  ;;  %v182_v24 = vld [vmem:[#allocation7 + $0x58] sm:$0xff]  ;;  %v2734_v25 = vpack.c.bf16 %v177_v20, %v175_v19  ;;  %v179_v27 = vld [vmem:[#allocation7 + $0x40] sm:$0xff]  ;;  %v2724_v29 = vpack.c.bf16 %v88_v21, %v87_v11 }
  0x53   :  { %2731 = vmatpush1.bf16.msra.mxu1 %v2730_v17  ;;  %v2736_v26 = vpack.c.bf16 %v182_v24, %v180_v23  ;;  %v181_v28 = vld [vmem:[#allocation7 + $0x50] sm:$0xff]  ;;  %v184_v30 = vld [vmem:[#allocation7 + $0x68] sm:$0xff]  ;;  %v186_v31 = vld [vmem:[#allocation7 + $0x78] sm:$0xff] }
  0x54   :  { %2719 = vmatpush3.bf16.msra.mxu0 %v2716_v5  ;;  %2733 = vmatprep.subr.bf16.mxu1 %v2732_v22  ;;  %v2738_v32 = vpack.c.bf16 %v181_v28, %v179_v27  ;;  %v2740_v33 = vpack.c.bf16 %v186_v31, %v184_v30  ;;  %v183_v34 = vld [vmem:[#allocation7 + $0x60] sm:$0xff]  ;;  %v185_v35 = vld [vmem:[#allocation7 + $0x70] sm:$0xff]  ;;  %v188_v36 = vld [vmem:[#allocation7 + $0x88] sm:$0xff] }
  0x55   :  { %2721 = vmatprep.subr.bf16.mxu0 %v2720_v16  ;;  %v190_v37 = vld [vmem:[#allocation7 + $0x98] sm:$0xff]  ;;  %v2742_v38 = vpack.c.bf16 %v185_v35, %v183_v34  ;;  %v187_v41 = vld [vmem:[#allocation7 + $0x80] sm:$0xff]  ;;  %v189_v42 = vld [vmem:[#allocation7 + $0x90] sm:$0xff] }
  0x56   :  { %v80_v39 = vld [vmem:[#allocation2 + $0x8] sm:$0xff]  ;;  %v2744_v40 = vpack.c.bf16 %v190_v37, %v188_v36  ;;  %v192_v43 = vld [vmem:[#allocation7 + $0xa8] sm:$0xff]  ;;  %v2746_v45 = vpack.c.bf16 %v189_v42, %v187_v41  ;;  %v191_v47 = vld [vmem:[#allocation7 + $0xa0] sm:$0xff] }
  0x57   :  { %2735 = vmatpush1.bf16.msra.mxu1 %v2734_v25  ;;  %v194_v44 = vld [vmem:[#allocation7 + $0xb8] sm:$0xff]  ;;  %v193_v48 = vld [vmem:[#allocation7 + $0xb0] sm:$0xff]  ;;  %v196_v49 = vld [vmem:[#allocation7 + $0xc8] sm:$0xff] }
  0x58   :  { %2723 = vmatpush3.bf16.msra.mxu0 %v2720_v16  ;;  %2737 = vmatprep.subr.bf16.mxu1 %v2736_v26  ;;  %v2748_v46 = vpack.c.bf16 %v194_v44, %v192_v43  ;;  %v198_v50 = vld [vmem:[#allocation7 + $0xd8] sm:$0xff]  ;;  %v2750_v51 = vpack.c.bf16 %v193_v48, %v191_v47  ;;  %v195_v53 = vld [vmem:[#allocation7 + $0xc0] sm:$0xff]  ;;  %v197_v54 = vld [vmem:[#allocation7 + $0xd0] sm:$0xff] }
  0x59   :  { %2725 = vmatprep.subr.bf16.mxu0 %v2724_v29  ;;  %v2752_v52 = vpack.c.bf16 %v198_v50, %v196_v49  ;;  %v200_v55 = vld [vmem:[#allocation7 + $0xe8] sm:$0xff]  ;;  %v202_v56 = vld [vmem:[#allocation7 + $0xf8] sm:$0xff]  ;;  %v2754_v57 = vpack.c.bf16 %v197_v54, %v195_v53  ;;  %v199_v59 = vld [vmem:[#allocation7 + $0xe0] sm:$0xff] }
  0x5a   :  { %v2756_v58 = vpack.c.bf16 %v202_v56, %v200_v55  ;;  %v201_v60 = vld [vmem:[#allocation7 + $0xf0] sm:$0xff]  ;;  %v281_v63 = vld [vmem:[#allocation8 + $0x8] sm:$0xff]  ;;  %v283_v1 = vld [vmem:[#allocation8 + $0x18] sm:$0xff] }
  0x5b   :  { %2739 = vmatpush1.bf16.msra.mxu1 %v2738_v32  ;;  %v2758_v61 = vpack.c.bf16 %v201_v60, %v199_v59  ;;  %v285_v0 = vld [vmem:[#allocation8 + $0x28] sm:$0xff]  ;;  %v287_v3 = vld [vmem:[#allocation8 + $0x38] sm:$0xff]  ;;  %v280_v4 = vld [vmem:[#allocation8] sm:$0xff] }
  0x5c   :  { %2727 = vmatpush3.bf16.msra.mxu0 %v2724_v29  ;;  %2741 = vmatprep.subr.bf16.mxu1 %v2740_v33  ;;  %v2760_v2 = vpack.c.bf16 %v285_v0, %v281_v63  ;;  %v284_v5 = vld [vmem:[#allocation8 + $0x20] sm:$0xff]  ;;  %v2824_v6 = vpack.c.bf16 %v287_v3, %v283_v1  ;;  %v289_v8 = vld [vmem:[#allocation8 + $0x48] sm:$0xff] }
  0x5d   :  { %v2762_v7 = vpack.c.bf16 %v284_v5, %v280_v4  ;;  %v293_v9 = vld [vmem:[#allocation8 + $0x68] sm:$0xff]  ;;  %v288_v11 = vld [vmem:[#allocation8 + $0x40] sm:$0xff] }
  0x5e   :  { %2761 = vmatprep.subr.bf16.mxu0 %v2760_v2  ;;  %v2764_v10 = vpack.c.bf16 %v293_v9, %v289_v8  ;;  %v292_v12 = vld [vmem:[#allocation8 + $0x60] sm:$0xff]  ;;  %v297_v14 = vld [vmem:[#allocation8 + $0x88] sm:$0xff] }
  0x5f   :  { %2672 = vmatmul.mubr.msk.f32.vlgmr.msra.gmra.mrb[0].mxu0 %vm89_vm0, %v80_v39  ;;  %2743 = vmatpush1.bf16.msra.mxu1 %v2742_v38  ;;  %v2766_v13 = vpack.c.bf16 %v292_v12, %v288_v11  ;;  %v301_v15 = vld [vmem:[#allocation8 + $0xa8] sm:$0xff]  ;;  %v296_v17 = vld [vmem:[#allocation8 + $0x80] sm:$0xff] }
  0x60   :  { %2745 = vmatprep.subr.bf16.mxu1 %v2744_v40  ;;  %2763 = vmatpush1.bf16.msra.mxu0 %v2762_v7  ;;  %v2768_v16 = vpack.c.bf16 %v301_v15, %v297_v14  ;;  %v300_v18 = vld [vmem:[#allocation8 + $0xa0] sm:$0xff]  ;;  %v305_v20 = vld [vmem:[#allocation8 + $0xc8] sm:$0xff] }
  0x61   :  { %2765 = vmatprep.subr.bf16.mxu0 %v2764_v10  ;;  %v2770_v19 = vpack.c.bf16 %v300_v18, %v296_v17  ;;  %v309_v21 = vld [vmem:[#allocation8 + $0xe8] sm:$0xff]  ;;  %v304_v23 = vld [vmem:[#allocation8 + $0xc0] sm:$0xff] }
  0x62   :  { %v2772_v22 = vpack.c.bf16 %v309_v21, %v305_v20  ;;  %v308_v24 = vld [vmem:[#allocation8 + $0xe0] sm:$0xff]  ;;  %v313_v25 = vld [vmem:[#allocation8 + $0x108] sm:$0xff] }
  0x63   :  { %2747 = vmatpush1.bf16.msra.mxu1 %v2746_v45  ;;  %v317_v26 = vld [vmem:[#allocation8 + $0x128] sm:$0xff]  ;;  %v2774_v27 = vpack.c.bf16 %v308_v24, %v304_v23  ;;  %v312_v29 = vld [vmem:[#allocation8 + $0x100] sm:$0xff] }
  0x64   :  { %2749 = vmatprep.subr.bf16.mxu1 %v2748_v46  ;;  %2767 = vmatpush1.bf16.msra.mxu0 %v2766_v13  ;;  %v2776_v28 = vpack.c.bf16 %v317_v26, %v313_v25  ;;  %v316_v30 = vld [vmem:[#allocation8 + $0x120] sm:$0xff]  ;;  %v321_v31 = vld [vmem:[#allocation8 + $0x148] sm:$0xff] }
  0x65   :  { %2769 = vmatprep.subr.bf16.mxu0 %v2768_v16  ;;  %v325_v32 = vld [vmem:[#allocation8 + $0x168] sm:$0xff]  ;;  %v2778_v33 = vpack.c.bf16 %v316_v30, %v312_v29  ;;  %v320_v35 = vld [vmem:[#allocation8 + $0x140] sm:$0xff] }
  0x66   :  { %v2780_v34 = vpack.c.bf16 %v325_v32, %v321_v31  ;;  %v324_v36 = vld [vmem:[#allocation8 + $0x160] sm:$0xff]  ;;  %v329_v37 = vld [vmem:[#allocation8 + $0x188] sm:$0xff]  ;;  %v282_v32 = vld [vmem:[#allocation8 + $0x10] sm:$0xff] }
  0x67   :  { %2751 = vmatpush1.bf16.msra.mxu1 %v2750_v51  ;;  %v333_v38 = vld [vmem:[#allocation8 + $0x1a8] sm:$0xff]  ;;  %v2782_v39 = vpack.c.bf16 %v324_v36, %v320_v35  ;;  %v328_v41 = vld [vmem:[#allocation8 + $0x180] sm:$0xff]  ;;  %v295_v35 = vld [vmem:[#allocation8 + $0x78] sm:$0xff] }
  0x68   :  { %2753 = vmatprep.subr.bf16.mxu1 %v2752_v52  ;;  %2771 = vmatpush1.bf16.msra.mxu0 %v2770_v19  ;;  %v2784_v40 = vpack.c.bf16 %v333_v38, %v329_v37  ;;  %v332_v42 = vld [vmem:[#allocation8 + $0x1a0] sm:$0xff]  ;;  %v337_v43 = vld [vmem:[#allocation8 + $0x1c8] sm:$0xff] }
  0x69   :  { %2773 = vmatprep.subr.bf16.mxu0 %v2772_v22  ;;  %v341_v44 = vld [vmem:[#allocation8 + $0x1e8] sm:$0xff]  ;;  %v2786_v45 = vpack.c.bf16 %v332_v42, %v328_v41  ;;  %v336_v47 = vld [vmem:[#allocation8 + $0x1c0] sm:$0xff]  ;;  %v299_v42 = vld [vmem:[#allocation8 + $0x98] sm:$0xff] }
  0x6a   :  { %v2788_v46 = vpack.c.bf16 %v341_v44, %v337_v43  ;;  %v340_v48 = vld [vmem:[#allocation8 + $0x1e0] sm:$0xff]  ;;  %v345_v49 = vld [vmem:[#allocation8 + $0x208] sm:$0xff]  ;;  %v303_v43 = vld [vmem:[#allocation8 + $0xb8] sm:$0xff] }
  0x6b   :  { %2755 = vmatpush1.bf16.msra.mxu1 %v2754_v57  ;;  %v349_v50 = vld [vmem:[#allocation8 + $0x228] sm:$0xff]  ;;  %v2790_v51 = vpack.c.bf16 %v340_v48, %v336_v47  ;;  %v344_v53 = vld [vmem:[#allocation8 + $0x200] sm:$0xff]  ;;  %v302_v47 = vld [vmem:[#allocation8 + $0xb0] sm:$0xff] }
  0x6c   :  { %2757 = vmatprep.subr.bf16.mxu1 %v2756_v58  ;;  %2775 = vmatpush1.bf16.msra.mxu0 %v2774_v27  ;;  %v2792_v52 = vpack.c.bf16 %v349_v50, %v345_v49  ;;  %v348_v54 = vld [vmem:[#allocation8 + $0x220] sm:$0xff]  ;;  %v353_v55 = vld [vmem:[#allocation8 + $0x248] sm:$0xff]  ;;  %v307_v48 = vld [vmem:[#allocation8 + $0xd8] sm:$0xff] }
  0x6d   :  { %2777 = vmatprep.subr.bf16.mxu0 %v2776_v28  ;;  %v357_v56 = vld [vmem:[#allocation8 + $0x268] sm:$0xff]  ;;  %v2794_v57 = vpack.c.bf16 %v348_v54, %v344_v53  ;;  %v352_v59 = vld [vmem:[#allocation8 + $0x240] sm:$0xff]  ;;  %v311_v49 = vld [vmem:[#allocation8 + $0xf8] sm:$0xff] }
  0x6e   :  { %v2796_v58 = vpack.c.bf16 %v357_v56, %v353_v55  ;;  %v356_v60 = vld [vmem:[#allocation8 + $0x260] sm:$0xff]  ;;  %v365_v63 = vld [vmem:[#allocation8 + $0x2a8] sm:$0xff]  ;;  %v310_v53 = vld [vmem:[#allocation8 + $0xf0] sm:$0xff] }
  0x6f   :  { %2759 = vmatpush1.bf16.msra.mxu1 %v2758_v61  ;;  %v361_v61 = vld [vmem:[#allocation8 + $0x288] sm:$0xff]  ;;  %v2798_v0 = vpack.c.bf16 %v356_v60, %v352_v59  ;;  %v360_v2 = vld [vmem:[#allocation8 + $0x280] sm:$0xff]  ;;  %v315_v54 = vld [vmem:[#allocation8 + $0x118] sm:$0xff] }
  0x70   :  { %2825 = vmatprep.subr.bf16.mxu1 %v2824_v6  ;;  %2779 = vmatpush1.bf16.msra.mxu0 %v2778_v33  ;;  %v2800_v1 = vpack.c.bf16 %v365_v63, %v361_v61  ;;  %v364_v3 = vld [vmem:[#allocation8 + $0x2a0] sm:$0xff]  ;;  %v369_v4 = vld [vmem:[#allocation8 + $0x2c8] sm:$0xff]  ;;  %v286_v33 = vld [vmem:[#allocation8 + $0x30] sm:$0xff] }
  0x71   :  { %2781 = vmatprep.subr.bf16.mxu0 %v2780_v34  ;;  %v373_v5 = vld [vmem:[#allocation8 + $0x2e8] sm:$0xff]  ;;  %v2802_v6 = vpack.c.bf16 %v364_v3, %v360_v2  ;;  %v368_v8 = vld [vmem:[#allocation8 + $0x2c0] sm:$0xff]  ;;  %v291_v34 = vld [vmem:[#allocation8 + $0x58] sm:$0xff]  ;;  %v2826_v36 = vpack.c.bf16 %v286_v33, %v282_v32 }
  0x72   :  { %v2804_v7 = vpack.c.bf16 %v373_v5, %v369_v4  ;;  %v372_v9 = vld [vmem:[#allocation8 + $0x2e0] sm:$0xff]  ;;  %v377_v10 = vld [vmem:[#allocation8 + $0x308] sm:$0xff]  ;;  %v2828_v38 = vpack.c.bf16 %v295_v35, %v291_v34  ;;  %v319_v55 = vld [vmem:[#allocation8 + $0x138] sm:$0xff] }
  0x73   :  { %v381_v11 = vld [vmem:[#allocation8 + $0x328] sm:$0xff]  ;;  %v2806_v12 = vpack.c.bf16 %v372_v9, %v368_v8  ;;  %v376_v14 = vld [vmem:[#allocation8 + $0x300] sm:$0xff]  ;;  %v318_v59 = vld [vmem:[#allocation8 + $0x130] sm:$0xff] }
  0x74   :  { %2783 = vmatpush1.bf16.msra.mxu0 %v2782_v39  ;;  %v2808_v13 = vpack.c.bf16 %v381_v11, %v377_v10  ;;  %v380_v15 = vld [vmem:[#allocation8 + $0x320] sm:$0xff]  ;;  %v385_v16 = vld [vmem:[#allocation8 + $0x348] sm:$0xff]  ;;  %v290_v39 = vld [vmem:[#allocation8 + $0x50] sm:$0xff] }
  0x75   :  { %2785 = vmatprep.subr.bf16.mxu0 %v2784_v40  ;;  %v389_v17 = vld [vmem:[#allocation8 + $0x368] sm:$0xff]  ;;  %v2810_v18 = vpack.c.bf16 %v380_v15, %v376_v14  ;;  %v384_v20 = vld [vmem:[#allocation8 + $0x340] sm:$0xff]  ;;  %v294_v40 = vld [vmem:[#allocation8 + $0x70] sm:$0xff] }
  0x76   :  { %v2812_v19 = vpack.c.bf16 %v389_v17, %v385_v16  ;;  %v388_v21 = vld [vmem:[#allocation8 + $0x360] sm:$0xff]  ;;  %v393_v22 = vld [vmem:[#allocation8 + $0x388] sm:$0xff]  ;;  %v2830_v44 = vpack.c.bf16 %v294_v40, %v290_v39  ;;  %v323_v60 = vld [vmem:[#allocation8 + $0x158] sm:$0xff] }
  0x77   :  { %v397_v23 = vld [vmem:[#allocation8 + $0x3a8] sm:$0xff]  ;;  %v2814_v24 = vpack.c.bf16 %v388_v21, %v384_v20  ;;  %v392_v26 = vld [vmem:[#allocation8 + $0x380] sm:$0xff]  ;;  %v327_v61 = vld [vmem:[#allocation8 + $0x178] sm:$0xff] }
  0x78   :  { %2787 = vmatpush1.bf16.msra.mxu0 %v2786_v45  ;;  %v2816_v25 = vpack.c.bf16 %v397_v23, %v393_v22  ;;  %v396_v27 = vld [vmem:[#allocation8 + $0x3a0] sm:$0xff]  ;;  %v401_v28 = vld [vmem:[#allocation8 + $0x3c8] sm:$0xff]  ;;  %v2832_v45 = vpack.c.bf16 %v303_v43, %v299_v42  ;;  %v326_v2 = vld [vmem:[#allocation8 + $0x170] sm:$0xff] }
  0x79   :  { %2789 = vmatprep.subr.bf16.mxu0 %v2788_v46  ;;  %v405_v29 = vld [vmem:[#allocation8 + $0x3e8] sm:$0xff]  ;;  %v2818_v30 = vpack.c.bf16 %v396_v27, %v392_v26  ;;  %v298_v46 = vld [vmem:[#allocation8 + $0x90] sm:$0xff]  ;;  %v331_v3 = vld [vmem:[#allocation8 + $0x198] sm:$0xff] }
  0x7a   :  { %v2820_v31 = vpack.c.bf16 %v405_v29, %v401_v28  ;;  %v2834_v50 = vpack.c.bf16 %v302_v47, %v298_v46  ;;  %v335_v4 = vld [vmem:[#allocation8 + $0x1b8] sm:$0xff]  ;;  %v334_v8 = vld [vmem:[#allocation8 + $0x1b0] sm:$0xff] }
  0x7b   :  { %v339_v9 = vld [vmem:[#allocation8 + $0x1d8] sm:$0xff]  ;;  %v342_v14 = vld [vmem:[#allocation8 + $0x1f0] sm:$0xff] }
  0x7c   :  { %2791 = vmatpush1.bf16.msra.mxu0 %v2790_v51  ;;  %v2836_v51 = vpack.c.bf16 %v311_v49, %v307_v48  ;;  %v343_v10 = vld [vmem:[#allocation8 + $0x1f8] sm:$0xff]  ;;  %v350_v20 = vld [vmem:[#allocation8 + $0x230] sm:$0xff] }
  0x7d   :  { %2793 = vmatprep.subr.bf16.mxu0 %v2792_v52  ;;  %v306_v52 = vld [vmem:[#allocation8 + $0xd0] sm:$0xff]  ;;  %v347_v15 = vld [vmem:[#allocation8 + $0x218] sm:$0xff] }
  0x7e   :  { %v2838_v56 = vpack.c.bf16 %v310_v53, %v306_v52  ;;  %v351_v16 = vld [vmem:[#allocation8 + $0x238] sm:$0xff]  ;;  %v358_v26 = vld [vmem:[#allocation8 + $0x270] sm:$0xff] }
  0x7f   :  { %v355_v21 = vld [vmem:[#allocation8 + $0x258] sm:$0xff]  ;;  %v366_v32 = vld [vmem:[#allocation8 + $0x2b0] sm:$0xff] }
  0x80   :  { %2795 = vmatpush1.bf16.msra.mxu0 %v2794_v57  ;;  %v2840_v57 = vpack.c.bf16 %v319_v55, %v315_v54  ;;  %v359_v22 = vld [vmem:[#allocation8 + $0x278] sm:$0xff]  ;;  %v378_v43 = vld [vmem:[#allocation8 + $0x310] sm:$0xff] }
  0x81   :  { %2797 = vmatprep.subr.bf16.mxu0 %v2796_v58  ;;  %v314_v58 = vld [vmem:[#allocation8 + $0x110] sm:$0xff]  ;;  %v363_v27 = vld [vmem:[#allocation8 + $0x298] sm:$0xff] }
  0x82   :  { %v2842_v63 = vpack.c.bf16 %v318_v59, %v314_v58  ;;  %v367_v28 = vld [vmem:[#allocation8 + $0x2b8] sm:$0xff]  ;;  %v386_v49 = vld [vmem:[#allocation8 + $0x350] sm:$0xff] }
  0x83   :  { %v371_v33 = vld [vmem:[#allocation8 + $0x2d8] sm:$0xff]  ;;  %v394_v55 = vld [vmem:[#allocation8 + $0x390] sm:$0xff] }
  0x84   :  { %2799 = vmatpush1.bf16.msra.mxu0 %v2798_v0  ;;  %v2844_v0 = vpack.c.bf16 %v327_v61, %v323_v60  ;;  %v375_v34 = vld [vmem:[#allocation8 + $0x2f8] sm:$0xff]  ;;  %v400_v61 = vld [vmem:[#allocation8 + $0x3c0] sm:$0xff] }
  0x85   :  { %2801 = vmatprep.subr.bf16.mxu0 %v2800_v1  ;;  %v322_v1 = vld [vmem:[#allocation8 + $0x150] sm:$0xff]  ;;  %v379_v39 = vld [vmem:[#allocation8 + $0x318] sm:$0xff] }
  0x86   :  { %v2846_v5 = vpack.c.bf16 %v326_v2, %v322_v1  ;;  %v383_v40 = vld [vmem:[#allocation8 + $0x338] sm:$0xff]  ;;  %v406_v2 = vld [vmem:[#allocation8 + $0x3f0] sm:$0xff] }
  0x87   :  { %v2872_v42 = vpack.c.bf16 %v383_v40, %v379_v39  ;;  %v391_v46 = vld [vmem:[#allocation8 + $0x378] sm:$0xff]  ;;  %v598_v40 = vld [vmem:[%s4353_s4 + $0x120] sm:$0xff] }
  0x88   :  { %2803 = vmatpush1.bf16.msra.mxu0 %v2802_v6  ;;  %v2848_v6 = vpack.c.bf16 %v335_v4, %v331_v3  ;;  %v399_v52 = vld [vmem:[#allocation8 + $0x3b8] sm:$0xff]  ;;  %v578_v4 = vld [vmem:[%s4353_s4 + $0x80] sm:$0xff] }
  0x89   :  { %2805 = vmatprep.subr.bf16.mxu0 %v2804_v7  ;;  %v330_v7 = vld [vmem:[#allocation8 + $0x190] sm:$0xff]  ;;  %v407_v58 = vld [vmem:[#allocation8 + $0x3f8] sm:$0xff] }
  0x8a   :  { %v2850_v11 = vpack.c.bf16 %v334_v8, %v330_v7  ;;  %v610_v7 = vld [vmem:[%s4353_s4 + $0x180] sm:$0xff]  ;;  %v611_v8 = vld [vmem:[%s4353_s4 + $0x188] sm:$0xff] }
  0x8c   :  { %2807 = vmatpush1.bf16.msra.mxu0 %v2806_v12  ;;  %v2852_v12 = vpack.c.bf16 %v343_v10, %v339_v9  ;;  %v2920_v9 = vpack.c.bf16 %v611_v8, %v610_v7  ;;  %v562_v10 = vld [vmem:[%s4353_s4] sm:$0xff] }
  0x8d   :  { %2809 = vmatprep.subr.bf16.mxu0 %v2808_v13  ;;  %v338_v13 = vld [vmem:[#allocation8 + $0x1d0] sm:$0xff] }
  0x8e   :  { %v2854_v17 = vpack.c.bf16 %v342_v14, %v338_v13  ;;  %v595_v13 = vld [vmem:[%s4353_s4 + $0x108] sm:$0xff]  ;;  %v580_v14 = vld [vmem:[%s4353_s4 + $0x90] sm:$0xff] }
  0x90   :  { %2811 = vmatpush1.bf16.msra.mxu0 %v2810_v18  ;;  %v2856_v18 = vpack.c.bf16 %v351_v16, %v347_v15  ;;  %v581_v15 = vld [vmem:[%s4353_s4 + $0x98] sm:$0xff]  ;;  %v612_v16 = vld [vmem:[%s4353_s4 + $0x190] sm:$0xff] }
  0x91   :  { %2813 = vmatprep.subr.bf16.mxu0 %v2812_v19  ;;  %v346_v19 = vld [vmem:[#allocation8 + $0x210] sm:$0xff] }
  0x92   :  { %v2858_v23 = vpack.c.bf16 %v350_v20, %v346_v19 }
  0x94   :  { %2815 = vmatpush1.bf16.msra.mxu0 %v2814_v24  ;;  %v2860_v24 = vpack.c.bf16 %v359_v22, %v355_v21  ;;  %v564_v21 = vld [vmem:[%s4353_s4 + $0x10] sm:$0xff]  ;;  %v565_v22 = vld [vmem:[%s4353_s4 + $0x18] sm:$0xff] }
  0x95   :  { %2817 = vmatprep.subr.bf16.mxu0 %v2816_v25  ;;  %v354_v25 = vld [vmem:[#allocation8 + $0x250] sm:$0xff] }
  0x96   :  { %v2862_v29 = vpack.c.bf16 %v358_v26, %v354_v25  ;;  %v596_v26 = vld [vmem:[%s4353_s4 + $0x110] sm:$0xff] }
  0x98   :  { %2819 = vmatpush1.bf16.msra.mxu0 %v2818_v30  ;;  %v2864_v30 = vpack.c.bf16 %v367_v28, %v363_v27  ;;  %v597_v27 = vld [vmem:[%s4353_s4 + $0x118] sm:$0xff]  ;;  %v582_v28 = vld [vmem:[%s4353_s4 + $0xa0] sm:$0xff] }
  0x99   :  { %2821 = vmatprep.subr.bf16.mxu0 %v2820_v31  ;;  %v362_v31 = vld [vmem:[#allocation8 + $0x290] sm:$0xff] }
  0x9a   :  { %v2866_v35 = vpack.c.bf16 %v366_v32, %v362_v31  ;;  %v615_v31 = vld [vmem:[%s4353_s4 + $0x1a8] sm:$0xff] }
 0x132   :  { %v2673_v37 = vpop.f32.mrb[0].mxu0 }
 0x133   :  { %v162_v41 = vpop.f32.mrb[1].mxu0 }
 0x134   :  { %268 = vmatmul.mubr.f32.vlgmr.msra.gmra.mrb[0].mxu1 %v162_v41 }
 0x135   :  { %273 = vmatprep.mubr.f32.mxu1 %v3602_v62  ;;  %2827 = vmatpush1.bf16.msra.mxu1 %v2826_v36  ;;  %v2868_v36 = vpack.c.bf16 %v375_v34, %v371_v33  ;;  %v2894_v33 = vpack.c.bf16 %v565_v22, %v564_v21  ;;  %v2926_v34 = vpack.c.bf16 %v597_v27, %v596_v26  ;;  %v574_v21 = vld [vmem:[%s4353_s4 + $0x60] sm:$0xff]  ;;  %v575_v22 = vld [vmem:[%s4353_s4 + $0x68] sm:$0xff]  ;;  %v592_v27 = vld [vmem:[%s4353_s4 + $0xf0] sm:$0xff] }
 0x136   :  { %2829 = vmatprep.subr.bf16.mxu1 %v2828_v38  ;;  %v374_v38 = vld [vmem:[#allocation8 + $0x2f0] sm:$0xff]  ;;  %v607_v26 = vld [vmem:[%s4353_s4 + $0x168] sm:$0xff] }
 0x138   :  { %274 = vmatmul.mubr.f32.gmra.mrb[2].mxu1 %v2673_v37  ;;  %v370_v37 = vld [vmem:[#allocation8 + $0x2d0] sm:$0xff] }
 0x139   :  { %2831 = vmatpush1.bf16.msra.mxu1 %v2830_v44  ;;  %v2870_v41 = vpack.c.bf16 %v374_v38, %v370_v37  ;;  %v382_v44 = vld [vmem:[#allocation8 + $0x330] sm:$0xff] }
 0x13a   :  { %2833 = vmatprep.subr.bf16.mxu1 %v2832_v45  ;;  %v387_v45 = vld [vmem:[#allocation8 + $0x358] sm:$0xff]  ;;  %v2874_v47 = vpack.c.bf16 %v382_v44, %v378_v43  ;;  %v585_v43 = vld [vmem:[%s4353_s4 + $0xb8] sm:$0xff]  ;;  %v616_v44 = vld [vmem:[%s4353_s4 + $0x1b0] sm:$0xff] }
 0x13b   :  { %v2876_v48 = vpack.c.bf16 %v391_v46, %v387_v45  ;;  %v617_v45 = vld [vmem:[%s4353_s4 + $0x1b8] sm:$0xff] }
 0x13d   :  { %2835 = vmatpush1.bf16.msra.mxu1 %v2834_v50  ;;  %v390_v50 = vld [vmem:[#allocation8 + $0x370] sm:$0xff] }
 0x13e   :  { %2837 = vmatprep.subr.bf16.mxu1 %v2836_v51  ;;  %v395_v51 = vld [vmem:[#allocation8 + $0x398] sm:$0xff]  ;;  %v2878_v53 = vpack.c.bf16 %v390_v50, %v386_v49  ;;  %v569_v49 = vld [vmem:[%s4353_s4 + $0x38] sm:$0xff] }
 0x13f   :  { %v2880_v54 = vpack.c.bf16 %v399_v52, %v395_v51  ;;  %v2932_v51 = vpack.c.bf16 %v617_v45, %v616_v44  ;;  %v600_v52 = vld [vmem:[%s4353_s4 + $0x130] sm:$0xff]  ;;  %v784_v44 = vld [vmem:[#allocation5 + $0x50] sm:$0xff]  ;;  %v785_v45 = vld [vmem:[#allocation5 + $0x58] sm:$0xff] }
 0x141   :  { %2839 = vmatpush1.bf16.msra.mxu1 %v2838_v56  ;;  %v398_v56 = vld [vmem:[#allocation8 + $0x3b0] sm:$0xff] }
 0x142   :  { %2841 = vmatprep.subr.bf16.mxu1 %v2840_v57  ;;  %v403_v57 = vld [vmem:[#allocation8 + $0x3d8] sm:$0xff]  ;;  %v2882_v59 = vpack.c.bf16 %v398_v56, %v394_v55  ;;  %v618_v56 = vld [vmem:[%s4353_s4 + $0x1c0] sm:$0xff] }
 0x143   :  { %v2884_v60 = vpack.c.bf16 %v407_v58, %v403_v57  ;;  %v587_v55 = vld [vmem:[%s4353_s4 + $0xc8] sm:$0xff] }
 0x144   :  { %v619_v57 = vld [vmem:[%s4353_s4 + $0x1c8] sm:$0xff] }
 0x145   :  { %2843 = vmatpush1.bf16.msra.mxu1 %v2842_v63  ;;  %v404_v63 = vld [vmem:[#allocation8 + $0x3e0] sm:$0xff] }
 0x146   :  { %2845 = vmatprep.subr.bf16.mxu1 %v2844_v0  ;;  %v402_v0 = vld [vmem:[#allocation8 + $0x3d0] sm:$0xff]  ;;  %v2822_v1 = vpack.c.bf16 %v404_v63, %v400_v61  ;;  %v571_v61 = vld [vmem:[%s4353_s4 + $0x48] sm:$0xff] }
 0x147   :  { %v2886_v3 = vpack.c.bf16 %v406_v2, %v402_v0  ;;  %v2936_v0 = vpack.c.bf16 %v619_v57, %v618_v56  ;;  %v603_v2 = vld [vmem:[%s4353_s4 + $0x148] sm:$0xff] }
 0x148   :  { %2823 = vmatpush1.bf16.msra.mxu0 %v2822_v1  ;;  %v602_v1 = vld [vmem:[%s4353_s4 + $0x140] sm:$0xff] }
 0x149   :  { %2847 = vmatpush1.bf16.msra.mxu1 %v2846_v5  ;;  %v579_v5 = vld [vmem:[%s4353_s4 + $0x88] sm:$0xff]  ;;  %v2938_v8 = vpack.c.bf16 %v603_v2, %v602_v1  ;;  %v872_v2 = vld [vmem:[#allocation7 + $0x100] sm:$0xff] }
 0x14a   :  { %2849 = vmatprep.subr.bf16.mxu1 %v2848_v6  ;;  %v2888_v6 = vpack.c.bf16 %v579_v5, %v578_v4  ;;  %v589_v4 = vld [vmem:[%s4353_s4 + $0xd8] sm:$0xff]  ;;  %v620_v5 = vld [vmem:[%s4353_s4 + $0x1d0] sm:$0xff] }
 0x14c   :  { %2889 = vmatprep.subr.bf16.mxu0 %v2888_v6  ;;  %v621_v6 = vld [vmem:[%s4353_s4 + $0x1d8] sm:$0xff] }
 0x14d   :  { %2851 = vmatpush1.bf16.msra.mxu1 %v2850_v11  ;;  %v563_v11 = vld [vmem:[%s4353_s4 + $0x8] sm:$0xff] }
 0x14e   :  { %2853 = vmatprep.subr.bf16.mxu1 %v2852_v12  ;;  %v594_v12 = vld [vmem:[%s4353_s4 + $0x100] sm:$0xff]  ;;  %v2890_v19 = vpack.c.bf16 %v563_v11, %v562_v10  ;;  %v573_v10 = vld [vmem:[%s4353_s4 + $0x58] sm:$0xff] }
 0x14f   :  { %v2922_v20 = vpack.c.bf16 %v595_v13, %v594_v12  ;;  %v2940_v12 = vpack.c.bf16 %v621_v6, %v620_v5  ;;  %v604_v13 = vld [vmem:[%s4353_s4 + $0x150] sm:$0xff]  ;;  %v879_v5 = vld [vmem:[#allocation7 + $0x138] sm:$0xff]  ;;  %v780_v6 = vld [vmem:[#allocation2 + $0x18] sm:$0xff] }
 0x151   :  { %2855 = vmatpush1.bf16.msra.mxu1 %v2854_v17  ;;  %v613_v17 = vld [vmem:[%s4353_s4 + $0x198] sm:$0xff] }
 0x152   :  { %2857 = vmatprep.subr.bf16.mxu1 %v2856_v18  ;;  %v2924_v25 = vpack.c.bf16 %v613_v17, %v612_v16  ;;  %v591_v16 = vld [vmem:[%s4353_s4 + $0xe8] sm:$0xff]  ;;  %v622_v17 = vld [vmem:[%s4353_s4 + $0x1e0] sm:$0xff] }
 0x155   :  { %2859 = vmatpush1.bf16.msra.mxu1 %v2858_v23 }
 0x156   :  { %2861 = vmatprep.subr.bf16.mxu1 %v2860_v24  ;;  %v2892_v24 = vpack.c.bf16 %v581_v15, %v580_v14  ;;  %v605_v14 = vld [vmem:[%s4353_s4 + $0x158] sm:$0xff]  ;;  %v590_v15 = vld [vmem:[%s4353_s4 + $0xe0] sm:$0xff] }
 0x159   :  { %2863 = vmatpush1.bf16.msra.mxu1 %v2862_v29  ;;  %v583_v29 = vld [vmem:[%s4353_s4 + $0xa8] sm:$0xff] }
 0x15a   :  { %2865 = vmatprep.subr.bf16.mxu1 %v2864_v30  ;;  %v614_v30 = vld [vmem:[%s4353_s4 + $0x1a0] sm:$0xff]  ;;  %v2896_v38 = vpack.c.bf16 %v583_v29, %v582_v28  ;;  %v593_v28 = vld [vmem:[%s4353_s4 + $0xf8] sm:$0xff]  ;;  %v624_v29 = vld [vmem:[%s4353_s4 + $0x1f0] sm:$0xff] }
 0x15b   :  { %v2928_v39 = vpack.c.bf16 %v615_v31, %v614_v30  ;;  %v625_v30 = vld [vmem:[%s4353_s4 + $0x1f8] sm:$0xff]  ;;  %v2914_v31 = vpack.c.bf16 %v575_v22, %v574_v21  ;;  %v884_v21 = vld [vmem:[#allocation7 + $0x160] sm:$0xff]  ;;  %v886_v22 = vld [vmem:[#allocation7 + $0x170] sm:$0xff] }
 0x15d   :  { %2867 = vmatpush1.bf16.msra.mxu1 %v2866_v35  ;;  %v566_v35 = vld [vmem:[%s4353_s4 + $0x20] sm:$0xff] }
 0x15e   :  { %2869 = vmatprep.subr.bf16.mxu1 %v2868_v36  ;;  %v567_v36 = vld [vmem:[%s4353_s4 + $0x28] sm:$0xff] }
 0x15f   :  { %v2898_v46 = vpack.c.bf16 %v567_v36, %v566_v35  ;;  %v577_v35 = vld [vmem:[%s4353_s4 + $0x78] sm:$0xff]  ;;  %v2948_v36 = vpack.c.bf16 %v625_v30, %v624_v29 }
 0x160   :  { %v893_v30 = vld [vmem:[#allocation7 + $0x1a8] sm:$0xff] }
 0x161   :  { %2871 = vmatpush1.bf16.msra.mxu1 %v2870_v41  ;;  %v599_v41 = vld [vmem:[%s4353_s4 + $0x128] sm:$0xff] }
 0x162   :  { %2873 = vmatprep.subr.bf16.mxu1 %v2872_v42  ;;  %v584_v42 = vld [vmem:[%s4353_s4 + $0xb0] sm:$0xff] }
 0x163   :  { %v2900_v50 = vpack.c.bf16 %v585_v43, %v584_v42  ;;  %v783_v42 = vld [vmem:[#allocation5 + $0x48] sm:$0xff] }
 0x165   :  { %2875 = vmatpush1.bf16.msra.mxu1 %v2874_v47  ;;  %v2930_v47 = vpack.c.bf16 %v599_v41, %v598_v40  ;;  %v782_v41 = vld [vmem:[#allocation5 + $0x40] sm:$0xff] }
 0x166   :  { %2877 = vmatprep.subr.bf16.mxu1 %v2876_v48  ;;  %v568_v48 = vld [vmem:[%s4353_s4 + $0x30] sm:$0xff]  ;;  %v2952_v43 = vpack.c.bf16 %v783_v42, %v782_v41  ;;  %v901_v42 = vld [vmem:[#allocation7 + $0x1e8] sm:$0xff] }
 0x167   :  { %v2902_v58 = vpack.c.bf16 %v569_v49, %v568_v48 }
 0x169   :  { %2879 = vmatpush1.bf16.msra.mxu1 %v2878_v53  ;;  %v601_v53 = vld [vmem:[%s4353_s4 + $0x138] sm:$0xff] }
 0x16a   :  { %2881 = vmatprep.subr.bf16.mxu1 %v2880_v54  ;;  %v586_v54 = vld [vmem:[%s4353_s4 + $0xc0] sm:$0xff] }
 0x16b   :  { %v2904_v63 = vpack.c.bf16 %v587_v55, %v586_v54 }
 0x16d   :  { %2883 = vmatpush1.bf16.msra.mxu1 %v2882_v59  ;;  %v2934_v59 = vpack.c.bf16 %v601_v53, %v600_v52  ;;  %v787_v52 = vld [vmem:[#allocation5 + $0x68] sm:$0xff] }
 0x16e   :  { %2885 = vmatprep.subr.bf16.mxu1 %v2884_v60  ;;  %v570_v60 = vld [vmem:[%s4353_s4 + $0x40] sm:$0xff] }
 0x16f   :  { %v2906_v7 = vpack.c.bf16 %v571_v61, %v570_v60  ;;  %v789_v60 = vld [vmem:[#allocation5 + $0x78] sm:$0xff] }
 0x171   :  { %2887 = vmatpush1.bf16.msra.mxu1 %v2886_v3  ;;  %v588_v3 = vld [vmem:[%s4353_s4 + $0xd0] sm:$0xff] }
 0x172   :  { %2921 = vmatprep.subr.bf16.mxu1 %v2920_v9  ;;  %v572_v9 = vld [vmem:[%s4353_s4 + $0x50] sm:$0xff]  ;;  %v2908_v11 = vpack.c.bf16 %v589_v4, %v588_v3  ;;  %v874_v3 = vld [vmem:[#allocation7 + $0x110] sm:$0xff]  ;;  %v877_v4 = vld [vmem:[#allocation7 + $0x128] sm:$0xff] }
 0x207   :  { %v269_v18 = vpop.f32.mrb[0].mxu1 }
 0x208   :  { %v271_v23 = vpop.f32.mrb[1].mxu1 }
 0x209   :  { %472 = vmatprep.mubr.f32.mxu0 %v271_v23  ;;  %549 = vmatprep.mubr.f32.mxu1 %v271_v23  ;;  %v2912_v23 = vpack.c.bf16 %v591_v16, %v590_v15  ;;  %v880_v15 = vld [vmem:[#allocation7 + $0x140] sm:$0xff]  ;;  %v882_v16 = vld [vmem:[#allocation7 + $0x150] sm:$0xff] }
 0x20a   :  { %473 = vmatmul.mubr.f32.vlgmr.msra.gmra.mrb[2].mxu0 %v269_v18  ;;  %550 = vmatmul.mubr.f32.vlgmr.msra.gmra.mrb[4].mxu1 %v269_v18  ;;  %v623_v18 = vld [vmem:[%s4353_s4 + $0x1e8] sm:$0xff] }
 0x20b   :  { %v275_v32 = vpop.f32.mrb[2].mxu1  ;;  %2891 = vmatpush3.bf16.msra.mxu0 %v2890_v19  ;;  %2923 = vmatpush3.bf16.msra.mxu1 %v2922_v20  ;;  %v2910_v19 = vpack.c.bf16 %v573_v10, %v572_v9  ;;  %v2942_v20 = vpack.c.bf16 %v605_v14, %v604_v13  ;;  %v876_v9 = vld [vmem:[#allocation7 + $0x120] sm:$0xff]  ;;  %v878_v10 = vld [vmem:[#allocation7 + $0x130] sm:$0xff] }
 0x20c   :  { %v277_v37 = vpop.f32.mrb[3].mxu1  ;;  %2893 = vmatprep.subr.bf16.mxu0 %v2892_v24  ;;  %2925 = vmatprep.subr.bf16.mxu1 %v2924_v25  ;;  %v2944_v24 = vpack.c.bf16 %v623_v18, %v622_v17  ;;  %v606_v25 = vld [vmem:[%s4353_s4 + $0x160] sm:$0xff]  ;;  %v2974_v13 = vpack.c.bf16 %v878_v10, %v876_v9  ;;  %v885_v17 = vld [vmem:[#allocation7 + $0x168] sm:$0xff]  ;;  %v887_v18 = vld [vmem:[#allocation7 + $0x178] sm:$0xff] }
 0x20d   :  { %478 = vmatprep.mubr.f32.mxu0 %v277_v37  ;;  %555 = vmatprep.mubr.f32.mxu1 %v277_v37  ;;  %v1006_v9 = vld [vmem:[#allocation8 + $0x4c0] sm:$0xff] }
 0x20e   :  { %479 = vmatmul.mubr.f32.gmra.mrb[4].mxu0 %v275_v32  ;;  %556 = vmatmul.mubr.f32.gmra.mrb[6].mxu1 %v275_v32  ;;  %v2946_v32 = vpack.c.bf16 %v607_v26, %v606_v25  ;;  %v891_v25 = vld [vmem:[#allocation7 + $0x198] sm:$0xff]  ;;  %v1010_v10 = vld [vmem:[#allocation8 + $0x4e0] sm:$0xff] }
 0x20f   :  { %2895 = vmatpush3.bf16.msra.mxu0 %v2894_v33  ;;  %2927 = vmatpush3.bf16.msra.mxu1 %v2926_v34  ;;  %v2916_v33 = vpack.c.bf16 %v593_v28, %v592_v27  ;;  %v576_v34 = vld [vmem:[%s4353_s4 + $0x70] sm:$0xff]  ;;  %v890_v28 = vld [vmem:[#allocation7 + $0x190] sm:$0xff] }
 0x210   :  { %2897 = vmatprep.subr.bf16.mxu0 %v2896_v38  ;;  %2929 = vmatprep.subr.bf16.mxu1 %v2928_v39  ;;  %v2918_v37 = vpack.c.bf16 %v577_v35, %v576_v34  ;;  %v608_v38 = vld [vmem:[%s4353_s4 + $0x170] sm:$0xff]  ;;  %v609_v39 = vld [vmem:[%s4353_s4 + $0x178] sm:$0xff]  ;;  %v894_v34 = vld [vmem:[#allocation7 + $0x1b0] sm:$0xff] }
 0x211   :  { %v2950_v40 = vpack.c.bf16 %v609_v39, %v608_v38  ;;  %v888_v27 = vld [vmem:[#allocation7 + $0x180] sm:$0xff] }
 0x212   :  { %v2986_v29 = vpack.c.bf16 %v890_v28, %v888_v27  ;;  %v896_v39 = vld [vmem:[#allocation7 + $0x1c0] sm:$0xff] }
 0x213   :  { %2899 = vmatpush3.bf16.msra.mxu0 %v2898_v46  ;;  %2931 = vmatpush3.bf16.msra.mxu1 %v2930_v47  ;;  %v1030_v27 = vld [vmem:[#allocation8 + $0x580] sm:$0xff] }
 0x214   :  { %2901 = vmatprep.subr.bf16.mxu0 %v2900_v50  ;;  %2933 = vmatprep.subr.bf16.mxu1 %v2932_v51  ;;  %v2956_v50 = vpack.c.bf16 %v785_v45, %v784_v44  ;;  %v786_v51 = vld [vmem:[#allocation5 + $0x60] sm:$0xff] }
 0x215   :  { %v2960_v57 = vpack.c.bf16 %v787_v52, %v786_v51  ;;  %v900_v44 = vld [vmem:[#allocation7 + $0x1e0] sm:$0xff]  ;;  %v989_v52 = vld [vmem:[#allocation8 + $0x438] sm:$0xff] }
 0x216   :  { %v1034_v28 = vld [vmem:[#allocation8 + $0x5a0] sm:$0xff] }
 0x217   :  { %2903 = vmatpush3.bf16.msra.mxu0 %v2902_v58  ;;  %2935 = vmatpush3.bf16.msra.mxu1 %v2934_v59  ;;  %v779_v58 = vld [vmem:[#allocation2 + $0x10] sm:$0xff]  ;;  %v788_v59 = vld [vmem:[#allocation5 + $0x70] sm:$0xff] }
 0x218   :  { %2905 = vmatprep.subr.bf16.mxu0 %v2904_v63  ;;  %2937 = vmatprep.subr.bf16.mxu1 %v2936_v0  ;;  %v2964_v61 = vpack.c.bf16 %v789_v60, %v788_v59  ;;  %v873_v63 = vld [vmem:[#allocation7 + $0x108] sm:$0xff]  ;;  %v875_v0 = vld [vmem:[#allocation7 + $0x118] sm:$0xff]  ;;  %v990_v60 = vld [vmem:[#allocation8 + $0x440] sm:$0xff] }
 0x219   :  { %v2968_v1 = vpack.c.bf16 %v875_v0, %v873_v63  ;;  %v999_v0 = vld [vmem:[#allocation8 + $0x488] sm:$0xff] }
 0x21b   :  { %2907 = vmatpush3.bf16.msra.mxu0 %v2906_v7  ;;  %2939 = vmatpush3.bf16.msra.mxu1 %v2938_v8  ;;  %v2970_v7 = vpack.c.bf16 %v874_v3, %v872_v2  ;;  %v2972_v8 = vpack.c.bf16 %v879_v5, %v877_v4  ;;  %v998_v3 = vld [vmem:[#allocation8 + $0x480] sm:$0xff] }
 0x21c   :  { %2909 = vmatprep.subr.bf16.mxu0 %v2908_v11  ;;  %2941 = vmatprep.subr.bf16.mxu1 %v2940_v12  ;;  %v881_v11 = vld [vmem:[#allocation7 + $0x148] sm:$0xff]  ;;  %v883_v12 = vld [vmem:[#allocation7 + $0x158] sm:$0xff]  ;;  %v1002_v4 = vld [vmem:[#allocation8 + $0x4a0] sm:$0xff] }
 0x21d   :  { %v2976_v14 = vpack.c.bf16 %v883_v12, %v881_v11  ;;  %v3010_v5 = vpack.c.bf16 %v1002_v4, %v998_v3  ;;  %v1015_v11 = vld [vmem:[#allocation8 + $0x508] sm:$0xff] }
 0x21e   :  { %v1019_v12 = vld [vmem:[#allocation8 + $0x528] sm:$0xff] }
 0x21f   :  { %2911 = vmatpush3.bf16.msra.mxu0 %v2910_v19  ;;  %2943 = vmatpush3.bf16.msra.mxu1 %v2942_v20  ;;  %v2978_v19 = vpack.c.bf16 %v882_v16, %v880_v15  ;;  %v2980_v20 = vpack.c.bf16 %v887_v18, %v885_v17  ;;  %v1014_v15 = vld [vmem:[#allocation8 + $0x500] sm:$0xff]  ;;  %v1023_v17 = vld [vmem:[#allocation8 + $0x548] sm:$0xff] }
 0x220   :  { %2913 = vmatprep.subr.bf16.mxu0 %v2912_v23  ;;  %2945 = vmatprep.subr.bf16.mxu1 %v2944_v24  ;;  %v2982_v23 = vpack.c.bf16 %v886_v22, %v884_v21  ;;  %v889_v24 = vld [vmem:[#allocation7 + $0x188] sm:$0xff]  ;;  %v1018_v16 = vld [vmem:[#allocation8 + $0x520] sm:$0xff] }
 0x221   :  { %v2984_v26 = vpack.c.bf16 %v891_v25, %v889_v24  ;;  %v1027_v18 = vld [vmem:[#allocation8 + $0x568] sm:$0xff]  ;;  %v1022_v21 = vld [vmem:[#allocation8 + $0x540] sm:$0xff] }
 0x222   :  { %v1026_v22 = vld [vmem:[#allocation8 + $0x560] sm:$0xff]  ;;  %v1035_v24 = vld [vmem:[#allocation8 + $0x5a8] sm:$0xff] }
 0x223   :  { %2915 = vmatpush3.bf16.msra.mxu0 %v2914_v31  ;;  %2947 = vmatpush3.bf16.msra.mxu1 %v2946_v32  ;;  %v895_v31 = vld [vmem:[#allocation7 + $0x1b8] sm:$0xff]  ;;  %v3022_v25 = vpack.c.bf16 %v1026_v22, %v1022_v21  ;;  %v1091_v3 = vld [vmem:[#allocation8 + $0x768] sm:$0xff] }
 0x224   :  { %2917 = vmatprep.subr.bf16.mxu0 %v2916_v33  ;;  %2949 = vmatprep.subr.bf16.mxu1 %v2948_v36  ;;  %v2988_v32 = vpack.c.bf16 %v895_v31, %v893_v30  ;;  %v892_v33 = vld [vmem:[#allocation7 + $0x1a0] sm:$0xff]  ;;  %v897_v36 = vld [vmem:[#allocation7 + $0x1c8] sm:$0xff]  ;;  %v3026_v31 = vpack.c.bf16 %v1034_v28, %v1030_v27 }
 0x225   :  { %v2990_v35 = vpack.c.bf16 %v894_v34, %v892_v33  ;;  %v1043_v30 = vld [vmem:[#allocation8 + $0x5e8] sm:$0xff]  ;;  %v1038_v33 = vld [vmem:[#allocation8 + $0x5c0] sm:$0xff] }
 0x226   :  { %v1042_v34 = vld [vmem:[#allocation8 + $0x5e0] sm:$0xff] }
 0x227   :  { %2919 = vmatpush3.bf16.msra.mxu0 %v2918_v37  ;;  %2951 = vmatpush3.bf16.msra.mxu1 %v2950_v40  ;;  %v899_v37 = vld [vmem:[#allocation7 + $0x1d8] sm:$0xff]  ;;  %v898_v40 = vld [vmem:[#allocation7 + $0x1d0] sm:$0xff] }
 0x228   :  { %2953 = vmatprep.subr.bf16.mxu0 %v2952_v43  ;;  %v2992_v38 = vpack.c.bf16 %v899_v37, %v897_v36  ;;  %v2994_v41 = vpack.c.bf16 %v898_v40, %v896_v39  ;;  %v1051_v36 = vld [vmem:[#allocation8 + $0x628] sm:$0xff]  ;;  %v3030_v37 = vpack.c.bf16 %v1042_v34, %v1038_v33  ;;  %v1046_v39 = vld [vmem:[#allocation8 + $0x600] sm:$0xff]  ;;  %v988_v33 = vld [vmem:[#allocation8 + $0x430] sm:$0xff] }
 0x229   :  { %v1050_v40 = vld [vmem:[#allocation8 + $0x620] sm:$0xff]  ;;  %v993_v34 = vld [vmem:[#allocation8 + $0x458] sm:$0xff] }
 0x2dd   :  { %v474_v46 = vpop.f32.mrb[2].mxu0  ;;  %v551_v47 = vpop.f32.mrb[4].mxu1 }
 0x2de   :  { %v476_v48 = vpop.f32.mrb[3].mxu0  ;;  %v553_v49 = vpop.f32.mrb[5].mxu1 }
 0x2df   :  { %690 = vmatprep.mubr.f32.mxu0 %v476_v48  ;;  %765 = vmatprep.mubr.f32.mxu1 %v553_v49  ;;  %v983_v48 = vld [vmem:[#allocation8 + $0x408] sm:$0xff] }
 0x2e0   :  { %691 = vmatmul.mubr.f32.vlgmr.msra.gmra.mrb[6].mxu0 %v474_v46  ;;  %766 = vmatmul.mubr.f32.vlgmr.msra.gmra.mrb[8].mxu1 %v551_v47  ;;  %v902_v46 = vld [vmem:[#allocation7 + $0x1f0] sm:$0xff]  ;;  %v987_v49 = vld [vmem:[#allocation8 + $0x428] sm:$0xff] }
 0x2e1   :  { %2955 = vmatpush3.bf16.msra.mxu0 %v2952_v43  ;;  %v480_v53 = vpop.f32.mrb[4].mxu0  ;;  %v557_v54 = vpop.f32.mrb[6].mxu1  ;;  %v903_v43 = vld [vmem:[#allocation7 + $0x1f8] sm:$0xff]  ;;  %v2998_v47 = vpack.c.bf16 %v902_v46, %v900_v44  ;;  %v3000_v51 = vpack.c.bf16 %v987_v49, %v983_v48  ;;  %v1058_v46 = vld [vmem:[#allocation8 + $0x660] sm:$0xff]  ;;  %v1067_v48 = vld [vmem:[#allocation8 + $0x6a8] sm:$0xff] }
 0x2e2   :  { %v482_v55 = vpop.f32.mrb[5].mxu0  ;;  %v559_v56 = vpop.f32.mrb[7].mxu1  ;;  %2957 = vmatprep.subr.bf16.mxu0 %v2956_v50  ;;  %v2996_v45 = vpack.c.bf16 %v903_v43, %v901_v42  ;;  %v1059_v42 = vld [vmem:[#allocation8 + $0x668] sm:$0xff]  ;;  %v3034_v43 = vpack.c.bf16 %v1050_v40, %v1046_v39  ;;  %v992_v39 = vld [vmem:[#allocation8 + $0x450] sm:$0xff] }
 0x2e3   :  { %695 = vmatprep.mubr.f32.mxu0 %v482_v55  ;;  %770 = vmatprep.mubr.f32.mxu1 %v559_v56  ;;  %v996_v40 = vld [vmem:[#allocation8 + $0x470] sm:$0xff] }
 0x2e4   :  { %696 = vmatmul.mubr.f32.gmra.mrb[8].mxu0 %v480_v53  ;;  %771 = vmatmul.mubr.f32.gmra.mrb[10].mxu1 %v557_v54  ;;  %v982_v53 = vld [vmem:[#allocation8 + $0x400] sm:$0xff] }
 0x2e5   :  { %2959 = vmatpush3.bf16.msra.mxu0 %v2956_v50  ;;  %2690 = vmatprep.mubr.msk.f32.mxu0 %vm89_vm0, %v779_v58  ;;  %v985_v50 = vld [vmem:[#allocation8 + $0x418] sm:$0xff]  ;;  %v986_v54 = vld [vmem:[#allocation8 + $0x420] sm:$0xff]  ;;  %v995_v58 = vld [vmem:[#allocation8 + $0x468] sm:$0xff] }
 0x2e6   :  { %2961 = vmatprep.subr.bf16.mxu0 %v2960_v57  ;;  %v3064_v55 = vpack.c.bf16 %v989_v52, %v985_v50  ;;  %v3002_v56 = vpack.c.bf16 %v986_v54, %v982_v53  ;;  %3001 = vmatprep.subr.bf16.mxu1 %v3000_v51  ;;  %v1062_v51 = vld [vmem:[#allocation8 + $0x680] sm:$0xff]  ;;  %v1071_v53 = vld [vmem:[#allocation8 + $0x6c8] sm:$0xff] }
 0x2e7   :  { %v1066_v52 = vld [vmem:[#allocation8 + $0x6a0] sm:$0xff]  ;;  %v1075_v54 = vld [vmem:[#allocation8 + $0x6e8] sm:$0xff] }
 0x2e8   :  { %3003 = vmatpush1.bf16.msra.mxu1 %v3002_v56  ;;  %v3044_v56 = vpack.c.bf16 %v1075_v54, %v1071_v53  ;;  %v1012_v53 = vld [vmem:[#allocation8 + $0x4f0] sm:$0xff]  ;;  %v1017_v54 = vld [vmem:[#allocation8 + $0x518] sm:$0xff] }
 0x2e9   :  { %2963 = vmatpush3.bf16.msra.mxu0 %v2960_v57  ;;  %v991_v57 = vld [vmem:[#allocation8 + $0x448] sm:$0xff] }
 0x2ea   :  { %2965 = vmatprep.subr.bf16.mxu0 %v2964_v61  ;;  %v3004_v59 = vpack.c.bf16 %v995_v58, %v991_v57  ;;  %v1070_v57 = vld [vmem:[#allocation8 + $0x6c0] sm:$0xff] }
 0x2eb   :  { %v1074_v58 = vld [vmem:[#allocation8 + $0x6e0] sm:$0xff] }
 0x2ec   :  { %3005 = vmatprep.subr.bf16.mxu1 %v3004_v59  ;;  %v1079_v59 = vld [vmem:[#allocation8 + $0x708] sm:$0xff] }
 0x2ed   :  { %2967 = vmatpush3.bf16.msra.mxu0 %v2964_v61  ;;  %v994_v61 = vld [vmem:[#allocation8 + $0x460] sm:$0xff] }
 0x2ee   :  { %2969 = vmatprep.subr.bf16.mxu0 %v2968_v1  ;;  %v3006_v63 = vpack.c.bf16 %v994_v61, %v990_v60  ;;  %v1003_v1 = vld [vmem:[#allocation8 + $0x4a8] sm:$0xff]  ;;  %v3046_v61 = vpack.c.bf16 %v1074_v58, %v1070_v57  ;;  %v1016_v58 = vld [vmem:[#allocation8 + $0x510] sm:$0xff] }
 0x2ef   :  { %v3008_v2 = vpack.c.bf16 %v1003_v1, %v999_v0  ;;  %v1083_v60 = vld [vmem:[#allocation8 + $0x728] sm:$0xff]  ;;  %v1078_v0 = vld [vmem:[#allocation8 + $0x700] sm:$0xff] }
 0x2f0   :  { %2691 = vmatmul.mubr.msk.f32.vlgmr.msra.gmra.mrb[10].mxu0 %vm89_vm0, %v780_v6  ;;  %3007 = vmatpush1.bf16.msra.mxu1 %v3006_v63  ;;  %v1007_v6 = vld [vmem:[#allocation8 + $0x4c8] sm:$0xff]  ;;  %v3048_v63 = vpack.c.bf16 %v1083_v60, %v1079_v59  ;;  %v1082_v1 = vld [vmem:[#allocation8 + $0x720] sm:$0xff]  ;;  %v1020_v59 = vld [vmem:[#allocation8 + $0x530] sm:$0xff] }
 0x2f1   :  { %2971 = vmatpush1.bf16.msra.mxu0 %v2970_v7  ;;  %968 = vmatprep.mubr.f32.mxu0 %v3602_v62  ;;  %v1011_v7 = vld [vmem:[#allocation8 + $0x4e8] sm:$0xff]  ;;  %v3050_v4 = vpack.c.bf16 %v1082_v1, %v1078_v0  ;;  %v1025_v60 = vld [vmem:[#allocation8 + $0x558] sm:$0xff]  ;;  %v1024_v1 = vld [vmem:[#allocation8 + $0x550] sm:$0xff] }
 0x2f2   :  { %2973 = vmatprep.subr.bf16.mxu0 %v2972_v8  ;;  %3009 = vmatprep.subr.bf16.mxu1 %v3008_v2  ;;  %v3012_v8 = vpack.c.bf16 %v1011_v7, %v1007_v6  ;;  %v1087_v2 = vld [vmem:[#allocation8 + $0x748] sm:$0xff]  ;;  %v1086_v6 = vld [vmem:[#allocation8 + $0x740] sm:$0xff] }
 0x2f3   :  { %v1090_v7 = vld [vmem:[#allocation8 + $0x760] sm:$0xff] }
 0x2f4   :  { %3011 = vmatpush1.bf16.msra.mxu1 %v3010_v5  ;;  %v3052_v5 = vpack.c.bf16 %v1091_v3, %v1087_v2  ;;  %v1028_v2 = vld [vmem:[#allocation8 + $0x570] sm:$0xff]  ;;  %v1033_v3 = vld [vmem:[#allocation8 + $0x598] sm:$0xff] }
 0x2f5   :  { %2975 = vmatpush1.bf16.msra.mxu0 %v2974_v13  ;;  %v3014_v13 = vpack.c.bf16 %v1010_v10, %v1006_v9  ;;  %3013 = vmatprep.subr.bf16.mxu1 %v3012_v8  ;;  %v1095_v8 = vld [vmem:[#allocation8 + $0x788] sm:$0xff]  ;;  %v3054_v10 = vpack.c.bf16 %v1090_v7, %v1086_v6  ;;  %v1032_v7 = vld [vmem:[#allocation8 + $0x590] sm:$0xff] }
 0x2f6   :  { %2977 = vmatprep.subr.bf16.mxu0 %v2976_v14  ;;  %v3016_v14 = vpack.c.bf16 %v1019_v12, %v1015_v11  ;;  %v1099_v9 = vld [vmem:[#allocation8 + $0x7a8] sm:$0xff]  ;;  %v1094_v12 = vld [vmem:[#allocation8 + $0x780] sm:$0xff] }
 0x2f7   :  { %v3056_v11 = vpack.c.bf16 %v1099_v9, %v1095_v8  ;;  %v1036_v8 = vld [vmem:[#allocation8 + $0x5b0] sm:$0xff]  ;;  %v1041_v9 = vld [vmem:[#allocation8 + $0x5d8] sm:$0xff] }
 0x2f8   :  { %3015 = vmatpush1.bf16.msra.mxu1 %v3014_v13  ;;  %v1098_v13 = vld [vmem:[#allocation8 + $0x7a0] sm:$0xff] }
 0x2f9   :  { %2979 = vmatpush1.bf16.msra.mxu0 %v2978_v19  ;;  %v3018_v19 = vpack.c.bf16 %v1018_v16, %v1014_v15  ;;  %3017 = vmatprep.subr.bf16.mxu1 %v3016_v14  ;;  %v1103_v14 = vld [vmem:[#allocation8 + $0x7c8] sm:$0xff]  ;;  %v3058_v16 = vpack.c.bf16 %v1098_v13, %v1094_v12  ;;  %v1040_v13 = vld [vmem:[#allocation8 + $0x5d0] sm:$0xff] }
 0x2fa   :  { %2981 = vmatprep.subr.bf16.mxu0 %v2980_v20  ;;  %v3020_v20 = vpack.c.bf16 %v1027_v18, %v1023_v17  ;;  %v1107_v15 = vld [vmem:[#allocation8 + $0x7e8] sm:$0xff] }
 0x2fb   :  { %v3060_v17 = vpack.c.bf16 %v1107_v15, %v1103_v14  ;;  %v1044_v14 = vld [vmem:[#allocation8 + $0x5f0] sm:$0xff]  ;;  %v1049_v15 = vld [vmem:[#allocation8 + $0x618] sm:$0xff] }
 0x2fc   :  { %3019 = vmatpush1.bf16.msra.mxu1 %v3018_v19 }
 0x2fd   :  { %2983 = vmatpush1.bf16.msra.mxu0 %v2982_v23  ;;  %v1031_v23 = vld [vmem:[#allocation8 + $0x588] sm:$0xff]  ;;  %3021 = vmatprep.subr.bf16.mxu1 %v3020_v20 }
 0x2fe   :  { %2985 = vmatprep.subr.bf16.mxu0 %v2984_v26  ;;  %v3024_v26 = vpack.c.bf16 %v1035_v24, %v1031_v23 }
 0x300   :  { %3023 = vmatpush1.bf16.msra.mxu1 %v3022_v25 }
 0x301   :  { %2987 = vmatpush1.bf16.msra.mxu0 %v2986_v29  ;;  %v1039_v29 = vld [vmem:[#allocation8 + $0x5c8] sm:$0xff]  ;;  %3025 = vmatprep.subr.bf16.mxu1 %v3024_v26 }
 0x302   :  { %2989 = vmatprep.subr.bf16.mxu0 %v2988_v32  ;;  %v3028_v32 = vpack.c.bf16 %v1043_v30, %v1039_v29 }
 0x304   :  { %3027 = vmatpush1.bf16.msra.mxu1 %v3026_v31 }
 0x305   :  { %2991 = vmatpush1.bf16.msra.mxu0 %v2990_v35  ;;  %v1047_v35 = vld [vmem:[#allocation8 + $0x608] sm:$0xff]  ;;  %3029 = vmatprep.subr.bf16.mxu1 %v3028_v32  ;;  %v984_v32 = vld [vmem:[#allocation8 + $0x410] sm:$0xff] }
 0x306   :  { %2993 = vmatprep.subr.bf16.mxu0 %v2992_v38  ;;  %v3032_v38 = vpack.c.bf16 %v1051_v36, %v1047_v35  ;;  %v997_v35 = vld [vmem:[#allocation8 + $0x478] sm:$0xff]  ;;  %v3066_v36 = vpack.c.bf16 %v988_v33, %v984_v32  ;;  %v1064_v33 = vld [vmem:[#allocation8 + $0x690] sm:$0xff] }
 0x308   :  { %3031 = vmatpush1.bf16.msra.mxu1 %v3030_v37 }
 0x309   :  { %2995 = vmatpush1.bf16.msra.mxu0 %v2994_v41  ;;  %v1055_v41 = vld [vmem:[#allocation8 + $0x648] sm:$0xff]  ;;  %3033 = vmatprep.subr.bf16.mxu1 %v3032_v38  ;;  %v3068_v38 = vpack.c.bf16 %v997_v35, %v993_v34  ;;  %v1068_v34 = vld [vmem:[#allocation8 + $0x6b0] sm:$0xff]  ;;  %v1073_v35 = vld [vmem:[#allocation8 + $0x6d8] sm:$0xff] }
 0x30a   :  { %2997 = vmatprep.subr.bf16.mxu0 %v2996_v45  ;;  %v3036_v44 = vpack.c.bf16 %v1059_v42, %v1055_v41  ;;  %v1054_v45 = vld [vmem:[#allocation8 + $0x640] sm:$0xff]  ;;  %v1001_v42 = vld [vmem:[#allocation8 + $0x498] sm:$0xff] }
 0x30b   :  { %v3038_v49 = vpack.c.bf16 %v1058_v46, %v1054_v45  ;;  %v1000_v46 = vld [vmem:[#allocation8 + $0x490] sm:$0xff] }
 0x30c   :  { %3035 = vmatpush1.bf16.msra.mxu1 %v3034_v43  ;;  %v1005_v43 = vld [vmem:[#allocation8 + $0x4b8] sm:$0xff] }
 0x30d   :  { %2999 = vmatpush1.bf16.msra.mxu0 %v2998_v47  ;;  %v1063_v47 = vld [vmem:[#allocation8 + $0x688] sm:$0xff]  ;;  %3037 = vmatprep.subr.bf16.mxu1 %v3036_v44  ;;  %v3070_v44 = vpack.c.bf16 %v996_v40, %v992_v39  ;;  %v3072_v45 = vpack.c.bf16 %v1005_v43, %v1001_v42  ;;  %v1072_v39 = vld [vmem:[#allocation8 + $0x6d0] sm:$0xff]  ;;  %v1085_v42 = vld [vmem:[#allocation8 + $0x738] sm:$0xff] }
 0x30e   :  { %3065 = vmatprep.subr.bf16.mxu0 %v3064_v55  ;;  %v3040_v50 = vpack.c.bf16 %v1067_v48, %v1063_v47  ;;  %v3042_v55 = vpack.c.bf16 %v1066_v52, %v1062_v51  ;;  %v1004_v47 = vld [vmem:[#allocation8 + $0x4b0] sm:$0xff]  ;;  %v1009_v48 = vld [vmem:[#allocation8 + $0x4d8] sm:$0xff] }
 0x30f   :  { %v1008_v52 = vld [vmem:[#allocation8 + $0x4d0] sm:$0xff] }
 0x310   :  { %3039 = vmatpush1.bf16.msra.mxu1 %v3038_v49  ;;  %v1013_v49 = vld [vmem:[#allocation8 + $0x4f8] sm:$0xff]  ;;  %v1076_v40 = vld [vmem:[#allocation8 + $0x6f0] sm:$0xff] }
 0x311   :  { %3041 = vmatprep.subr.bf16.mxu1 %v3040_v50  ;;  %v3074_v50 = vpack.c.bf16 %v1004_v47, %v1000_v46  ;;  %v3076_v51 = vpack.c.bf16 %v1013_v49, %v1009_v48  ;;  %v3110_v43 = vpack.c.bf16 %v1076_v40, %v1072_v39  ;;  %v1084_v46 = vld [vmem:[#allocation8 + $0x730] sm:$0xff]  ;;  %v1089_v47 = vld [vmem:[#allocation8 + $0x758] sm:$0xff] }
 0x312   :  { %v1093_v48 = vld [vmem:[#allocation8 + $0x778] sm:$0xff]  ;;  %v2271_v39 = vld [vmem:[%s4353_s4 + $0x220] sm:$0xff] }
 0x313   :  { %v2272_v40 = vld [vmem:[%s4353_s4 + $0x228] sm:$0xff] }
 0x314   :  { %3043 = vmatpush1.bf16.msra.mxu1 %v3042_v55  ;;  %v1021_v55 = vld [vmem:[#allocation8 + $0x538] sm:$0xff] }
 0x315   :  { %3045 = vmatprep.subr.bf16.mxu1 %v3044_v56  ;;  %v3078_v56 = vpack.c.bf16 %v1012_v53, %v1008_v52  ;;  %v3080_v57 = vpack.c.bf16 %v1021_v55, %v1017_v54  ;;  %v1092_v52 = vld [vmem:[#allocation8 + $0x770] sm:$0xff]  ;;  %v1097_v53 = vld [vmem:[#allocation8 + $0x798] sm:$0xff] }
 0x316   :  { %v1101_v54 = vld [vmem:[#allocation8 + $0x7b8] sm:$0xff] }
 0x318   :  { %3047 = vmatpush1.bf16.msra.mxu1 %v3046_v61  ;;  %v1029_v61 = vld [vmem:[#allocation8 + $0x578] sm:$0xff] }
 0x319   :  { %3049 = vmatprep.subr.bf16.mxu1 %v3048_v63  ;;  %v3082_v63 = vpack.c.bf16 %v1020_v59, %v1016_v58  ;;  %v3084_v0 = vpack.c.bf16 %v1029_v61, %v1025_v60  ;;  %v1100_v58 = vld [vmem:[#allocation8 + $0x7b0] sm:$0xff]  ;;  %v1105_v59 = vld [vmem:[#allocation8 + $0x7d8] sm:$0xff] }
 0x31a   :  { %v1109_v60 = vld [vmem:[#allocation8 + $0x7f8] sm:$0xff] }
 0x31c   :  { %3051 = vmatpush1.bf16.msra.mxu1 %v3050_v4  ;;  %v1037_v4 = vld [vmem:[#allocation8 + $0x5b8] sm:$0xff] }
 0x31d   :  { %3053 = vmatprep.subr.bf16.mxu1 %v3052_v5  ;;  %v3086_v5 = vpack.c.bf16 %v1028_v2, %v1024_v1  ;;  %v3088_v6 = vpack.c.bf16 %v1037_v4, %v1033_v3  ;;  %v1106_v1 = vld [vmem:[#allocation8 + $0x7e0] sm:$0xff]  ;;  %v1104_v2 = vld [vmem:[#allocation8 + $0x7d0] sm:$0xff] }
 0x31e   :  { %v1108_v4 = vld [vmem:[#allocation8 + $0x7f0] sm:$0xff] }
 0x320   :  { %3055 = vmatpush1.bf16.msra.mxu1 %v3054_v10  ;;  %v1045_v10 = vld [vmem:[#allocation8 + $0x5f8] sm:$0xff] }
 0x321   :  { %3057 = vmatprep.subr.bf16.mxu1 %v3056_v11  ;;  %v3090_v11 = vpack.c.bf16 %v1036_v8, %v1032_v7  ;;  %v3092_v12 = vpack.c.bf16 %v1045_v10, %v1041_v9  ;;  %v2284_v7 = vld [vmem:[%s4353_s4 + $0x288] sm:$0xff]  ;;  %v2315_v9 = vld [vmem:[%s4353_s4 + $0x380] sm:$0xff] }
 0x322   :  { %v2316_v10 = vld [vmem:[%s4353_s4 + $0x388] sm:$0xff] }
 0x324   :  { %3059 = vmatpush1.bf16.msra.mxu1 %v3058_v16  ;;  %v1053_v16 = vld [vmem:[#allocation8 + $0x638] sm:$0xff] }
 0x325   :  { %3061 = vmatprep.subr.bf16.mxu1 %v3060_v17  ;;  %v3094_v17 = vpack.c.bf16 %v1044_v14, %v1040_v13  ;;  %v2268_v13 = vld [vmem:[%s4353_s4 + $0x208] sm:$0xff]  ;;  %v2299_v14 = vld [vmem:[%s4353_s4 + $0x300] sm:$0xff] }
 0x3b3   :  { %v2439_v18 = vpop.f32.mrb[6].mxu0  ;;  %v2477_v19 = vpop.f32.mrb[8].mxu1 }
 0x3b4   :  { %v2440_v20 = vpop.f32.mrb[7].mxu0  ;;  %v2478_v21 = vpop.f32.mrb[9].mxu1 }
 0x3b5   :  { %v2441_v22 = vadd.f32 %v2440_v20, %v2439_v18  ;;  %v2479_v23 = vadd.f32 %v2478_v21, %v2477_v19  ;;  %v3096_v18 = vpack.c.bf16 %v1053_v16, %v1049_v15  ;;  %v1048_v19 = vld [vmem:[#allocation8 + $0x610] sm:$0xff]  ;;  %v1057_v21 = vld [vmem:[#allocation8 + $0x658] sm:$0xff]  ;;  %v2285_v16 = vld [vmem:[%s4353_s4 + $0x290] sm:$0xff] }
 0x3b6   :  { %v1052_v20 = vld [vmem:[#allocation8 + $0x630] sm:$0xff]  ;;  %v2300_v15 = vld [vmem:[%s4353_s4 + $0x308] sm:$0xff] }
 0x3b7   :  { %v3902_v24 = vadd.f32 %v2479_v23, %v2441_v22  ;;  %v2442_v25 = vpop.f32.mrb[8].mxu0  ;;  %v2480_v26 = vpop.f32.mrb[10].mxu1  ;;  %v1061_v22 = vld [vmem:[#allocation8 + $0x678] sm:$0xff]  ;;  %v3098_v23 = vpack.c.bf16 %v1052_v20, %v1048_v19  ;;  %v2318_v19 = vld [vmem:[%s4353_s4 + $0x398] sm:$0xff] }
 0x3b8   :  { %v2443_v27 = vpop.f32.mrb[9].mxu0  ;;  %v2481_v28 = vpop.f32.mrb[11].mxu1 }
 0x3b9   :  { %v2444_v29 = vadd.f32 %v2443_v27, %v2442_v25  ;;  %v2482_v30 = vadd.f32 %v2481_v28, %v2480_v26  ;;  %v3100_v25 = vpack.c.bf16 %v1061_v22, %v1057_v21  ;;  %v1056_v26 = vld [vmem:[#allocation8 + $0x650] sm:$0xff]  ;;  %v1065_v28 = vld [vmem:[#allocation8 + $0x698] sm:$0xff]  ;;  %v3162_v22 = vpack.c.bf16 %v2300_v15, %v2299_v14  ;;  %v2278_v14 = vld [vmem:[%s4353_s4 + $0x258] sm:$0xff] }
 0x3ba   :  { %v1060_v27 = vld [vmem:[#allocation8 + $0x670] sm:$0xff] }
 0x3bb   :  { %v3904_v31 = vadd.f32 %v2482_v30, %v2444_v29  ;;  %v1069_v29 = vld [vmem:[#allocation8 + $0x6b8] sm:$0xff]  ;;  %v3102_v30 = vpack.c.bf16 %v1060_v27, %v1056_v26 }
 0x3bc   :  { %v3104_v32 = vpack.c.bf16 %v1069_v29, %v1065_v28  ;;  %v2301_v29 = vld [vmem:[%s4353_s4 + $0x310] sm:$0xff] }
 0x3c3   :  { %v2692_v37 = vpop.f32.mrb[10].mxu0 }
 0x3c4   :  { %v862_v41 = vpop.f32.mrb[11].mxu0 }
 0x3c5   :  { %969 = vmatmul.mubr.f32.vlgmr.msra.gmra.mrb[12].mxu0 %v862_v41  ;;  %v1081_v41 = vld [vmem:[#allocation8 + $0x718] sm:$0xff] }
 0x3c6   :  { %974 = vmatprep.mubr.f32.mxu0 %v3602_v62  ;;  %3067 = vmatpush1.bf16.msra.mxu0 %v3066_v36  ;;  %v1077_v36 = vld [vmem:[#allocation8 + $0x6f8] sm:$0xff] }
 0x3c7   :  { %3069 = vmatprep.subr.bf16.mxu0 %v3068_v38  ;;  %v3108_v38 = vpack.c.bf16 %v1077_v36, %v1073_v35  ;;  %v2320_v35 = vld [vmem:[%s4353_s4 + $0x3a8] sm:$0xff] }
 0x3c9   :  { %975 = vmatmul.mubr.f32.gmra.mrb[14].mxu0 %v2692_v37  ;;  %v3106_v37 = vpack.c.bf16 %v1068_v34, %v1064_v33  ;;  %v2288_v33 = vld [vmem:[%s4353_s4 + $0x2a8] sm:$0xff]  ;;  %v2319_v34 = vld [vmem:[%s4353_s4 + $0x3a0] sm:$0xff] }
 0x3ca   :  { %3071 = vmatpush1.bf16.msra.mxu0 %v3070_v44  ;;  %v3112_v44 = vpack.c.bf16 %v1085_v42, %v1081_v41 }
 0x3cb   :  { %3073 = vmatprep.subr.bf16.mxu0 %v3072_v45  ;;  %v1080_v45 = vld [vmem:[#allocation8 + $0x710] sm:$0xff] }
 0x3cc   :  { %v3114_v49 = vpack.c.bf16 %v1084_v46, %v1080_v45  ;;  %v2304_v45 = vld [vmem:[%s4353_s4 + $0x328] sm:$0xff]  ;;  %v2289_v46 = vld [vmem:[%s4353_s4 + $0x2b0] sm:$0xff] }
 0x3ce   :  { %3075 = vmatpush1.bf16.msra.mxu0 %v3074_v50  ;;  %v3116_v50 = vpack.c.bf16 %v1093_v48, %v1089_v47  ;;  %v2290_v47 = vld [vmem:[%s4353_s4 + $0x2b8] sm:$0xff]  ;;  %v2321_v48 = vld [vmem:[%s4353_s4 + $0x3b0] sm:$0xff] }
 0x3cf   :  { %3077 = vmatprep.subr.bf16.mxu0 %v3076_v51  ;;  %v1088_v51 = vld [vmem:[#allocation8 + $0x750] sm:$0xff] }
 0x3d0   :  { %v3118_v55 = vpack.c.bf16 %v1092_v52, %v1088_v51  ;;  %v2273_v52 = vld [vmem:[%s4353_s4 + $0x230] sm:$0xff] }
 0x3d2   :  { %3079 = vmatpush1.bf16.msra.mxu0 %v3078_v56  ;;  %v3120_v56 = vpack.c.bf16 %v1101_v54, %v1097_v53  ;;  %v2274_v53 = vld [vmem:[%s4353_s4 + $0x238] sm:$0xff]  ;;  %v3140_v54 = vpack.c.bf16 %v2290_v47, %v2289_v46  ;;  %v1485_v47 = vld [vmem:[#allocation5 + $0x80] sm:$0xff] }
 0x3d3   :  { %3081 = vmatprep.subr.bf16.mxu0 %v3080_v57  ;;  %v1096_v57 = vld [vmem:[#allocation8 + $0x790] sm:$0xff] }
 0x3d4   :  { %v3122_v61 = vpack.c.bf16 %v1100_v58, %v1096_v57  ;;  %v2306_v57 = vld [vmem:[%s4353_s4 + $0x338] sm:$0xff]  ;;  %v2291_v58 = vld [vmem:[%s4353_s4 + $0x2c0] sm:$0xff] }
 0x3d6   :  { %3083 = vmatpush1.bf16.msra.mxu0 %v3082_v63  ;;  %v3124_v63 = vpack.c.bf16 %v1109_v60, %v1105_v59  ;;  %v2292_v59 = vld [vmem:[%s4353_s4 + $0x2c8] sm:$0xff]  ;;  %v2323_v60 = vld [vmem:[%s4353_s4 + $0x3c0] sm:$0xff] }
 0x3d7   :  { %3085 = vmatprep.subr.bf16.mxu0 %v3084_v0  ;;  %v1102_v0 = vld [vmem:[#allocation8 + $0x7c0] sm:$0xff] }
 0x3d8   :  { %v3062_v3 = vpack.c.bf16 %v1106_v1, %v1102_v0  ;;  %v2275_v1 = vld [vmem:[%s4353_s4 + $0x240] sm:$0xff] }
 0x3da   :  { %3087 = vmatpush1.bf16.msra.mxu0 %v3086_v5  ;;  %v3126_v5 = vpack.c.bf16 %v1108_v4, %v1104_v2  ;;  %3063 = vmatpush1.bf16.msra.mxu1 %v3062_v3  ;;  %v2276_v2 = vld [vmem:[%s4353_s4 + $0x248] sm:$0xff]  ;;  %v3144_v3 = vpack.c.bf16 %v2292_v59, %v2291_v58  ;;  %v1490_v58 = vld [vmem:[#allocation5 + $0xa8] sm:$0xff] }
 0x3db   :  { %3089 = vmatprep.subr.bf16.mxu0 %v3088_v6  ;;  %v2283_v6 = vld [vmem:[%s4353_s4 + $0x280] sm:$0xff] }
 0x3dc   :  { %v3128_v8 = vpack.c.bf16 %v2284_v7, %v2283_v6  ;;  %v2308_v6 = vld [vmem:[%s4353_s4 + $0x348] sm:$0xff]  ;;  %v2293_v7 = vld [vmem:[%s4353_s4 + $0x2d0] sm:$0xff] }
 0x3de   :  { %3091 = vmatpush1.bf16.msra.mxu0 %v3090_v11  ;;  %v3160_v11 = vpack.c.bf16 %v2316_v10, %v2315_v9  ;;  %3129 = vmatprep.subr.bf16.mxu1 %v3128_v8  ;;  %v2294_v8 = vld [vmem:[%s4353_s4 + $0x2d8] sm:$0xff]  ;;  %v2325_v9 = vld [vmem:[%s4353_s4 + $0x3d0] sm:$0xff] }
 0x3df   :  { %3093 = vmatprep.subr.bf16.mxu0 %v3092_v12  ;;  %v2267_v12 = vld [vmem:[%s4353_s4 + $0x200] sm:$0xff]  ;;  %v2326_v10 = vld [vmem:[%s4353_s4 + $0x3d8] sm:$0xff]  ;;  %v3148_v15 = vpack.c.bf16 %v2294_v8, %v2293_v7  ;;  %v1575_v8 = vld [vmem:[#allocation7 + $0x200] sm:$0xff] }
 0x3e0   :  { %v3130_v21 = vpack.c.bf16 %v2268_v13, %v2267_v12  ;;  %v2277_v13 = vld [vmem:[%s4353_s4 + $0x250] sm:$0xff] }
 0x3e2   :  { %3095 = vmatpush1.bf16.msra.mxu0 %v3094_v17  ;;  %v2286_v17 = vld [vmem:[%s4353_s4 + $0x298] sm:$0xff] }
 0x3e3   :  { %3097 = vmatprep.subr.bf16.mxu0 %v3096_v18  ;;  %v2317_v18 = vld [vmem:[%s4353_s4 + $0x390] sm:$0xff]  ;;  %v3132_v27 = vpack.c.bf16 %v2286_v17, %v2285_v16  ;;  %v3180_v16 = vpack.c.bf16 %v2326_v10, %v2325_v9  ;;  %v1577_v9 = vld [vmem:[#allocation7 + $0x210] sm:$0xff]  ;;  %v1580_v10 = vld [vmem:[#allocation7 + $0x228] sm:$0xff] }
 0x3e4   :  { %v3164_v28 = vpack.c.bf16 %v2318_v19, %v2317_v18  ;;  %v2309_v17 = vld [vmem:[%s4353_s4 + $0x350] sm:$0xff]  ;;  %v2310_v18 = vld [vmem:[%s4353_s4 + $0x358] sm:$0xff]  ;;  %v2295_v19 = vld [vmem:[%s4353_s4 + $0x2e0] sm:$0xff] }
 0x3e6   :  { %3099 = vmatpush1.bf16.msra.mxu0 %v3098_v23  ;;  %v2269_v23 = vld [vmem:[%s4353_s4 + $0x210] sm:$0xff] }
 0x3e7   :  { %3101 = vmatprep.subr.bf16.mxu0 %v3100_v25  ;;  %v2270_v25 = vld [vmem:[%s4353_s4 + $0x218] sm:$0xff] }
 0x3ea   :  { %3103 = vmatpush1.bf16.msra.mxu0 %v3102_v30  ;;  %v2302_v30 = vld [vmem:[%s4353_s4 + $0x318] sm:$0xff] }
 0x3eb   :  { %3105 = vmatprep.subr.bf16.mxu0 %v3104_v32  ;;  %v2287_v32 = vld [vmem:[%s4353_s4 + $0x2a0] sm:$0xff] }
 0x3ec   :  { %v3136_v42 = vpack.c.bf16 %v2288_v33, %v2287_v32  ;;  %v2312_v32 = vld [vmem:[%s4353_s4 + $0x368] sm:$0xff]  ;;  %v2297_v33 = vld [vmem:[%s4353_s4 + $0x2f0] sm:$0xff] }
 0x3ee   :  { %3107 = vmatpush1.bf16.msra.mxu0 %v3106_v37  ;;  %v3134_v37 = vpack.c.bf16 %v2270_v25, %v2269_v23  ;;  %v3150_v23 = vpack.c.bf16 %v2278_v14, %v2277_v13  ;;  %v3182_v25 = vpack.c.bf16 %v2310_v18, %v2309_v17  ;;  %v3210_v13 = vpack.c.bf16 %v1577_v9, %v1575_v8  ;;  %v1584_v17 = vld [vmem:[#allocation7 + $0x248] sm:$0xff]  ;;  %v1586_v18 = vld [vmem:[#allocation7 + $0x258] sm:$0xff] }
 0x3ef   :  { %3109 = vmatprep.subr.bf16.mxu0 %v3108_v38  ;;  %v3166_v38 = vpack.c.bf16 %v2302_v30, %v2301_v29  ;;  %v2311_v30 = vld [vmem:[%s4353_s4 + $0x360] sm:$0xff]  ;;  %v1698_v9 = vld [vmem:[#allocation8 + $0x868] sm:$0xff] }
 0x3f2   :  { %3111 = vmatpush1.bf16.msra.mxu0 %v3110_v43  ;;  %v3168_v43 = vpack.c.bf16 %v2320_v35, %v2319_v34  ;;  %v2298_v34 = vld [vmem:[%s4353_s4 + $0x2f8] sm:$0xff]  ;;  %v2329_v35 = vld [vmem:[%s4353_s4 + $0x3f0] sm:$0xff] }
 0x3f3   :  { %3113 = vmatprep.subr.bf16.mxu0 %v3112_v44  ;;  %v2303_v44 = vld [vmem:[%s4353_s4 + $0x320] sm:$0xff] }
 0x3f4   :  { %v3170_v51 = vpack.c.bf16 %v2304_v45, %v2303_v44  ;;  %v2313_v44 = vld [vmem:[%s4353_s4 + $0x370] sm:$0xff]  ;;  %v2314_v45 = vld [vmem:[%s4353_s4 + $0x378] sm:$0xff] }
 0x3f5   :  { %v3190_v46 = vpack.c.bf16 %v2314_v45, %v2313_v44  ;;  %v1600_v44 = vld [vmem:[#allocation7 + $0x2c8] sm:$0xff]  ;;  %v1602_v45 = vld [vmem:[#allocation7 + $0x2d8] sm:$0xff] }
 0x3f6   :  { %3115 = vmatpush1.bf16.msra.mxu0 %v3114_v49  ;;  %v2322_v49 = vld [vmem:[%s4353_s4 + $0x3b8] sm:$0xff] }
 0x3f7   :  { %3117 = vmatprep.subr.bf16.mxu0 %v3116_v50  ;;  %v3138_v50 = vpack.c.bf16 %v2272_v40, %v2271_v39  ;;  %v3156_v39 = vpack.c.bf16 %v2298_v34, %v2297_v33  ;;  %v2281_v40 = vld [vmem:[%s4353_s4 + $0x270] sm:$0xff]  ;;  %v1594_v33 = vld [vmem:[#allocation7 + $0x298] sm:$0xff] }
 0x3fa   :  { %3119 = vmatpush1.bf16.msra.mxu0 %v3118_v55  ;;  %v3172_v55 = vpack.c.bf16 %v2322_v49, %v2321_v48  ;;  %v1486_v48 = vld [vmem:[#allocation5 + $0x88] sm:$0xff] }
 0x3fb   :  { %3121 = vmatprep.subr.bf16.mxu0 %v3120_v56  ;;  %v2305_v56 = vld [vmem:[%s4353_s4 + $0x330] sm:$0xff]  ;;  %v3192_v49 = vpack.c.bf16 %v1486_v48, %v1485_v47  ;;  %v1601_v48 = vld [vmem:[#allocation7 + $0x2d0] sm:$0xff] }
 0x3fc   :  { %v3174_v0 = vpack.c.bf16 %v2306_v57, %v2305_v56  ;;  %v1489_v57 = vld [vmem:[#allocation5 + $0xa0] sm:$0xff] }
 0x3fd   :  { %v1599_v47 = vld [vmem:[#allocation7 + $0x2c0] sm:$0xff] }
 0x3fe   :  { %3123 = vmatpush1.bf16.msra.mxu0 %v3122_v61  ;;  %v2324_v61 = vld [vmem:[%s4353_s4 + $0x3c8] sm:$0xff] }
 0x3ff   :  { %3125 = vmatprep.subr.bf16.mxu0 %v3124_v63  ;;  %v3142_v63 = vpack.c.bf16 %v2274_v53, %v2273_v52  ;;  %v3176_v4 = vpack.c.bf16 %v2324_v61, %v2323_v60 }
 0x402   :  { %3127 = vmatpush1.bf16.msra.mxu0 %v3126_v5  ;;  %v2307_v5 = vld [vmem:[%s4353_s4 + $0x340] sm:$0xff] }
 0x403   :  { %3161 = vmatprep.subr.bf16.mxu0 %v3160_v11  ;;  %v3146_v11 = vpack.c.bf16 %v2276_v2, %v2275_v1  ;;  %v3178_v12 = vpack.c.bf16 %v2308_v6, %v2307_v5  ;;  %v1482_v1 = vld [vmem:[#allocation2 + $0x20] sm:$0xff]  ;;  %v1576_v5 = vld [vmem:[#allocation7 + $0x208] sm:$0xff]  ;;  %v1578_v6 = vld [vmem:[#allocation7 + $0x218] sm:$0xff] }
 0x404   :  { %v1491_v2 = vld [vmem:[#allocation5 + $0xb0] sm:$0xff]  ;;  %v3208_v7 = vpack.c.bf16 %v1578_v6, %v1576_v5  ;;  %v1694_v6 = vld [vmem:[#allocation8 + $0x848] sm:$0xff] }
 0x498   :  { %v970_v20 = vpop.f32.mrb[12].mxu0 }
 0x499   :  { %v972_v26 = vpop.f32.mrb[13].mxu0 }
 0x49a   :  { %1174 = vmatprep.mubr.f32.mxu1 %v972_v26  ;;  %1251 = vmatprep.mubr.f32.mxu0 %v972_v26  ;;  %v2279_v26 = vld [vmem:[%s4353_s4 + $0x260] sm:$0xff] }
 0x49b   :  { %1175 = vmatmul.mubr.f32.vlgmr.msra.gmra.mrb[12].mxu1 %v970_v20  ;;  %1252 = vmatmul.mubr.f32.vlgmr.msra.gmra.mrb[16].mxu0 %v970_v20  ;;  %v2296_v20 = vld [vmem:[%s4353_s4 + $0x2e8] sm:$0xff] }
 0x49c   :  { %v976_v36 = vpop.f32.mrb[14].mxu0  ;;  %3131 = vmatpush3.bf16.msra.mxu1 %v3130_v21  ;;  %3163 = vmatpush3.bf16.msra.mxu0 %v3162_v22  ;;  %v2327_v21 = vld [vmem:[%s4353_s4 + $0x3e0] sm:$0xff]  ;;  %v2328_v22 = vld [vmem:[%s4353_s4 + $0x3e8] sm:$0xff] }
 0x49d   :  { %v978_v41 = vpop.f32.mrb[15].mxu0  ;;  %3133 = vmatprep.subr.bf16.mxu1 %v3132_v27  ;;  %3165 = vmatprep.subr.bf16.mxu0 %v3164_v28  ;;  %v2280_v27 = vld [vmem:[%s4353_s4 + $0x268] sm:$0xff]  ;;  %v3152_v28 = vpack.c.bf16 %v2296_v20, %v2295_v19  ;;  %v3184_v29 = vpack.c.bf16 %v2328_v22, %v2327_v21  ;;  %v3216_v20 = vpack.c.bf16 %v1586_v18, %v1584_v17  ;;  %v1583_v21 = vld [vmem:[#allocation7 + $0x240] sm:$0xff]  ;;  %v1585_v22 = vld [vmem:[#allocation7 + $0x250] sm:$0xff] }
 0x49e   :  { %1180 = vmatprep.mubr.f32.mxu1 %v978_v41  ;;  %1257 = vmatprep.mubr.f32.mxu0 %v978_v41  ;;  %v2282_v41 = vld [vmem:[%s4353_s4 + $0x278] sm:$0xff] }
 0x49f   :  { %1181 = vmatmul.mubr.f32.gmra.mrb[14].mxu1 %v976_v36  ;;  %1258 = vmatmul.mubr.f32.gmra.mrb[18].mxu0 %v976_v36  ;;  %v2330_v36 = vld [vmem:[%s4353_s4 + $0x3f8] sm:$0xff] }
 0x4a0   :  { %3135 = vmatpush3.bf16.msra.mxu1 %v3134_v37  ;;  %3167 = vmatpush3.bf16.msra.mxu0 %v3166_v38  ;;  %v3154_v37 = vpack.c.bf16 %v2280_v27, %v2279_v26  ;;  %v3186_v38 = vpack.c.bf16 %v2312_v32, %v2311_v30  ;;  %v3218_v26 = vpack.c.bf16 %v1585_v22, %v1583_v21  ;;  %v1592_v32 = vld [vmem:[#allocation7 + $0x288] sm:$0xff]  ;;  %v1701_v22 = vld [vmem:[#allocation8 + $0x880] sm:$0xff] }
 0x4a1   :  { %3137 = vmatprep.subr.bf16.mxu1 %v3136_v42  ;;  %3169 = vmatprep.subr.bf16.mxu0 %v3168_v43  ;;  %v3188_v42 = vpack.c.bf16 %v2330_v36, %v2329_v35  ;;  %v3158_v43 = vpack.c.bf16 %v2282_v41, %v2281_v40  ;;  %v3224_v34 = vpack.c.bf16 %v1594_v33, %v1592_v32  ;;  %v1591_v35 = vld [vmem:[#allocation7 + $0x280] sm:$0xff]  ;;  %v1593_v36 = vld [vmem:[#allocation7 + $0x290] sm:$0xff]  ;;  %v1702_v17 = vld [vmem:[#allocation8 + $0x888] sm:$0xff] }
 0x4a2   :  { %v1595_v41 = vld [vmem:[#allocation7 + $0x2a0] sm:$0xff]  ;;  %v1706_v18 = vld [vmem:[#allocation8 + $0x8a8] sm:$0xff] }
 0x4a3   :  { %v3248_v21 = vpack.c.bf16 %v1706_v18, %v1702_v17  ;;  %v1724_v17 = vld [vmem:[#allocation8 + $0x938] sm:$0xff] }
 0x4a4   :  { %3139 = vmatpush3.bf16.msra.mxu1 %v3138_v50  ;;  %3171 = vmatpush3.bf16.msra.mxu0 %v3170_v51  ;;  %v1487_v50 = vld [vmem:[#allocation5 + $0x90] sm:$0xff]  ;;  %v1488_v51 = vld [vmem:[#allocation5 + $0x98] sm:$0xff] }
 0x4a5   :  { %3141 = vmatprep.subr.bf16.mxu1 %v3140_v54  ;;  %3173 = vmatprep.subr.bf16.mxu0 %v3172_v55  ;;  %v3196_v56 = vpack.c.bf16 %v1488_v51, %v1487_v50  ;;  %v1604_v50 = vld [vmem:[#allocation7 + $0x2e8] sm:$0xff]  ;;  %v1606_v51 = vld [vmem:[#allocation7 + $0x2f8] sm:$0xff] }
 0x4a8   :  { %3143 = vmatpush3.bf16.msra.mxu1 %v3142_v63  ;;  %3175 = vmatpush3.bf16.msra.mxu0 %v3174_v0  ;;  %v3200_v0 = vpack.c.bf16 %v1490_v58, %v1489_v57  ;;  %v1690_v57 = vld [vmem:[#allocation8 + $0x828] sm:$0xff]  ;;  %v1688_v58 = vld [vmem:[#allocation8 + $0x818] sm:$0xff] }
 0x4a9   :  { %3145 = vmatprep.subr.bf16.mxu1 %v3144_v3  ;;  %3177 = vmatprep.subr.bf16.mxu0 %v3176_v4  ;;  %v1492_v3 = vld [vmem:[#allocation5 + $0xb8] sm:$0xff] }
 0x4aa   :  { %v3204_v4 = vpack.c.bf16 %v1492_v3, %v1491_v2 }
 0x4ac   :  { %3147 = vmatpush3.bf16.msra.mxu1 %v3146_v11  ;;  %3179 = vmatpush3.bf16.msra.mxu0 %v3178_v12  ;;  %v1582_v11 = vld [vmem:[#allocation7 + $0x238] sm:$0xff] }
 0x4ad   :  { %3149 = vmatprep.subr.bf16.mxu1 %v3148_v15  ;;  %3181 = vmatprep.subr.bf16.mxu0 %v3180_v16  ;;  %v1483_v12 = vld [vmem:[#allocation2 + $0x28] sm:$0xff]  ;;  %v3212_v14 = vpack.c.bf16 %v1582_v11, %v1580_v10  ;;  %v1579_v15 = vld [vmem:[#allocation7 + $0x220] sm:$0xff]  ;;  %v1581_v16 = vld [vmem:[#allocation7 + $0x230] sm:$0xff]  ;;  %v3244_v10 = vpack.c.bf16 %v1698_v9, %v1694_v6 }
 0x4ae   :  { %v3214_v19 = vpack.c.bf16 %v1581_v16, %v1579_v15  ;;  %v1693_v11 = vld [vmem:[#allocation8 + $0x840] sm:$0xff]  ;;  %v1716_v6 = vld [vmem:[#allocation8 + $0x8f8] sm:$0xff] }
 0x4af   :  { %v1737_v9 = vld [vmem:[#allocation8 + $0x9a0] sm:$0xff] }
 0x4b0   :  { %3151 = vmatpush3.bf16.msra.mxu1 %v3150_v23  ;;  %3183 = vmatpush3.bf16.msra.mxu0 %v3182_v25  ;;  %v1588_v23 = vld [vmem:[#allocation7 + $0x268] sm:$0xff]  ;;  %v1590_v25 = vld [vmem:[#allocation7 + $0x278] sm:$0xff] }
 0x4b1   :  { %3153 = vmatprep.subr.bf16.mxu1 %v3152_v28  ;;  %3185 = vmatprep.subr.bf16.mxu0 %v3184_v29  ;;  %v3220_v27 = vpack.c.bf16 %v1590_v25, %v1588_v23  ;;  %v1587_v28 = vld [vmem:[#allocation7 + $0x260] sm:$0xff]  ;;  %v1589_v29 = vld [vmem:[#allocation7 + $0x270] sm:$0xff] }
 0x4b2   :  { %v3222_v30 = vpack.c.bf16 %v1589_v29, %v1587_v28  ;;  %v1710_v29 = vld [vmem:[#allocation8 + $0x8c8] sm:$0xff] }
 0x4b4   :  { %3155 = vmatpush3.bf16.msra.mxu1 %v3154_v37  ;;  %3187 = vmatpush3.bf16.msra.mxu0 %v3186_v38  ;;  %v3226_v37 = vpack.c.bf16 %v1593_v36, %v1591_v35  ;;  %v1596_v38 = vld [vmem:[#allocation7 + $0x2a8] sm:$0xff]  ;;  %v1713_v35 = vld [vmem:[#allocation8 + $0x8e0] sm:$0xff] }
 0x4b5   :  { %3157 = vmatprep.subr.bf16.mxu1 %v3156_v39  ;;  %3189 = vmatprep.subr.bf16.mxu0 %v3188_v42  ;;  %v1598_v39 = vld [vmem:[#allocation7 + $0x2b8] sm:$0xff]  ;;  %v1597_v42 = vld [vmem:[#allocation7 + $0x2b0] sm:$0xff]  ;;  %v1718_v36 = vld [vmem:[#allocation8 + $0x908] sm:$0xff] }
 0x4b6   :  { %v3228_v40 = vpack.c.bf16 %v1598_v39, %v1596_v38  ;;  %v1722_v38 = vld [vmem:[#allocation8 + $0x928] sm:$0xff] }
 0x4b8   :  { %3159 = vmatpush3.bf16.msra.mxu1 %v3158_v43  ;;  %3191 = vmatpush3.bf16.msra.mxu0 %v3190_v46  ;;  %v3230_v43 = vpack.c.bf16 %v1597_v42, %v1595_v41  ;;  %v3232_v46 = vpack.c.bf16 %v1602_v45, %v1600_v44  ;;  %v1691_v41 = vld [vmem:[#allocation8 + $0x830] sm:$0xff]  ;;  %v1696_v42 = vld [vmem:[#allocation8 + $0x858] sm:$0xff]  ;;  %v1717_v45 = vld [vmem:[#allocation8 + $0x900] sm:$0xff] }
 0x4b9   :  { %3193 = vmatprep.subr.bf16.mxu1 %v3192_v49  ;;  %v1700_v44 = vld [vmem:[#allocation8 + $0x878] sm:$0xff] }
 0x56e   :  { %v1176_v52 = vpop.f32.mrb[12].mxu1  ;;  %v1253_v53 = vpop.f32.mrb[16].mxu0 }
 0x56f   :  { %v1178_v54 = vpop.f32.mrb[13].mxu1  ;;  %v1255_v55 = vpop.f32.mrb[17].mxu0 }
 0x570   :  { %1393 = vmatprep.mubr.f32.mxu1 %v1178_v54  ;;  %1468 = vmatprep.mubr.f32.mxu0 %v1255_v55  ;;  %v1605_v54 = vld [vmem:[#allocation7 + $0x2f0] sm:$0xff] }
 0x571   :  { %1394 = vmatmul.mubr.f32.vlgmr.msra.gmra.mrb[16].mxu1 %v1176_v52  ;;  %1469 = vmatmul.mubr.f32.vlgmr.msra.gmra.mrb[20].mxu0 %v1253_v53  ;;  %v3236_v52 = vpack.c.bf16 %v1606_v51, %v1604_v50  ;;  %v1603_v53 = vld [vmem:[#allocation7 + $0x2e0] sm:$0xff]  ;;  %v3308_v51 = vpack.c.bf16 %v1700_v44, %v1696_v42  ;;  %v1731_v42 = vld [vmem:[#allocation8 + $0x970] sm:$0xff] }
 0x572   :  { %3195 = vmatpush3.bf16.msra.mxu1 %v3192_v49  ;;  %v1182_v59 = vpop.f32.mrb[14].mxu1  ;;  %v1259_v60 = vpop.f32.mrb[18].mxu0  ;;  %v3234_v49 = vpack.c.bf16 %v1601_v48, %v1599_v47  ;;  %v3238_v55 = vpack.c.bf16 %v1605_v54, %v1603_v53  ;;  %v1726_v47 = vld [vmem:[#allocation8 + $0x948] sm:$0xff]  ;;  %v1699_v53 = vld [vmem:[#allocation8 + $0x870] sm:$0xff]  ;;  %v1704_v54 = vld [vmem:[#allocation8 + $0x898] sm:$0xff] }
 0x573   :  { %v1184_v61 = vpop.f32.mrb[15].mxu1  ;;  %v1261_v63 = vpop.f32.mrb[19].mxu0  ;;  %3197 = vmatprep.subr.bf16.mxu1 %v3196_v56  ;;  %v1730_v48 = vld [vmem:[#allocation8 + $0x968] sm:$0xff] }
 0x574   :  { %1398 = vmatprep.mubr.f32.mxu1 %v1184_v61  ;;  %1473 = vmatprep.mubr.f32.mxu0 %v1261_v63  ;;  %v1692_v63 = vld [vmem:[#allocation8 + $0x838] sm:$0xff] }
 0x575   :  { %1399 = vmatmul.mubr.f32.gmra.mrb[18].mxu1 %v1182_v59  ;;  %1474 = vmatmul.mubr.f32.gmra.mrb[22].mxu0 %v1259_v60 }
 0x576   :  { %3199 = vmatpush3.bf16.msra.mxu1 %v3196_v56  ;;  %2709 = vmatprep.mubr.msk.f32.mxu1 %vm89_vm0, %v1482_v1  ;;  %v1686_v56 = vld [vmem:[#allocation8 + $0x808] sm:$0xff]  ;;  %v1689_v1 = vld [vmem:[#allocation8 + $0x820] sm:$0xff] }
 0x577   :  { %3201 = vmatprep.subr.bf16.mxu1 %v3200_v0  ;;  %v3240_v61 = vpack.c.bf16 %v1690_v57, %v1686_v56  ;;  %v1708_v57 = vld [vmem:[#allocation8 + $0x8b8] sm:$0xff] }
 0x579   :  { %3241 = vmatprep.subr.bf16.mxu0 %v3240_v61  ;;  %v1734_v61 = vld [vmem:[#allocation8 + $0x988] sm:$0xff] }
 0x57a   :  { %3203 = vmatpush3.bf16.msra.mxu1 %v3200_v0  ;;  %v1685_v0 = vld [vmem:[#allocation8 + $0x800] sm:$0xff] }
 0x57b   :  { %3205 = vmatprep.subr.bf16.mxu1 %v3204_v4  ;;  %v3242_v5 = vpack.c.bf16 %v1689_v1, %v1685_v0  ;;  %v3312_v1 = vpack.c.bf16 %v1708_v57, %v1704_v54  ;;  %v1739_v54 = vld [vmem:[#allocation8 + $0x9b0] sm:$0xff]  ;;  %v1748_v57 = vld [vmem:[#allocation8 + $0x9f8] sm:$0xff] }
 0x57d   :  { %3243 = vmatpush1.bf16.msra.mxu0 %v3242_v5 }
 0x57e   :  { %3207 = vmatpush3.bf16.msra.mxu1 %v3204_v4  ;;  %v3304_v4 = vpack.c.bf16 %v1692_v63, %v1688_v58  ;;  %3245 = vmatprep.subr.bf16.mxu0 %v3244_v10  ;;  %v3260_v58 = vpack.c.bf16 %v1730_v48, %v1726_v47  ;;  %v1738_v63 = vld [vmem:[#allocation8 + $0x9a8] sm:$0xff]  ;;  %v1757_v47 = vld [vmem:[#allocation8 + $0xa40] sm:$0xff] }
 0x57f   :  { %3209 = vmatprep.subr.bf16.mxu1 %v3208_v7  ;;  %v1742_v10 = vld [vmem:[#allocation8 + $0x9c8] sm:$0xff]  ;;  %v1761_v48 = vld [vmem:[#allocation8 + $0xa60] sm:$0xff] }
 0x581   :  { %2710 = vmatmul.mubr.msk.f32.vlgmr.msra.gmra.mrb[20].mxu1 %vm89_vm0, %v1483_v12  ;;  %v1697_v12 = vld [vmem:[#allocation8 + $0x860] sm:$0xff] }
 0x582   :  { %3211 = vmatpush1.bf16.msra.mxu1 %v3210_v13  ;;  %1671 = vmatprep.mubr.f32.mxu1 %v3602_v62  ;;  %v3246_v16 = vpack.c.bf16 %v1697_v12, %v1693_v11  ;;  %v1746_v11 = vld [vmem:[#allocation8 + $0x9e8] sm:$0xff] }
 0x583   :  { %3213 = vmatprep.subr.bf16.mxu1 %v3212_v14  ;;  %v3268_v18 = vpack.c.bf16 %v1746_v11, %v1742_v10  ;;  %v1782_v10 = vld [vmem:[#allocation8 + $0xb08] sm:$0xff] }
 0x584   :  { %3247 = vmatpush1.bf16.msra.mxu0 %v3246_v16  ;;  %v1786_v11 = vld [vmem:[#allocation8 + $0xb28] sm:$0xff] }
 0x585   :  { %3249 = vmatprep.subr.bf16.mxu0 %v3248_v21  ;;  %v1750_v21 = vld [vmem:[#allocation8 + $0xa08] sm:$0xff] }
 0x586   :  { %3215 = vmatpush1.bf16.msra.mxu1 %v3214_v19 }
 0x587   :  { %3217 = vmatprep.subr.bf16.mxu1 %v3216_v20 }
 0x58a   :  { %3219 = vmatpush1.bf16.msra.mxu1 %v3218_v26 }
 0x58b   :  { %3221 = vmatprep.subr.bf16.mxu1 %v3220_v27  ;;  %v1705_v27 = vld [vmem:[#allocation8 + $0x8a0] sm:$0xff] }
 0x58c   :  { %v3250_v28 = vpack.c.bf16 %v1705_v27, %v1701_v22  ;;  %v1754_v22 = vld [vmem:[#allocation8 + $0xa28] sm:$0xff]  ;;  %v1719_v27 = vld [vmem:[#allocation8 + $0x910] sm:$0xff] }
 0x58e   :  { %3223 = vmatpush1.bf16.msra.mxu1 %v3222_v30  ;;  %v1714_v30 = vld [vmem:[#allocation8 + $0x8e8] sm:$0xff]  ;;  %3251 = vmatpush1.bf16.msra.mxu0 %v3250_v28  ;;  %v1723_v28 = vld [vmem:[#allocation8 + $0x930] sm:$0xff] }
 0x58f   :  { %3225 = vmatprep.subr.bf16.mxu1 %v3224_v34  ;;  %v3252_v33 = vpack.c.bf16 %v1714_v30, %v1710_v29  ;;  %v1709_v34 = vld [vmem:[#allocation8 + $0x8c0] sm:$0xff]  ;;  %v1728_v29 = vld [vmem:[#allocation8 + $0x958] sm:$0xff] }
 0x590   :  { %v3254_v39 = vpack.c.bf16 %v1713_v35, %v1709_v34  ;;  %v1749_v34 = vld [vmem:[#allocation8 + $0xa00] sm:$0xff] }
 0x591   :  { %3253 = vmatprep.subr.bf16.mxu0 %v3252_v33  ;;  %v3272_v33 = vpack.c.bf16 %v1754_v22, %v1750_v21  ;;  %v1753_v35 = vld [vmem:[#allocation8 + $0xa20] sm:$0xff]  ;;  %v1790_v21 = vld [vmem:[#allocation8 + $0xb48] sm:$0xff] }
 0x592   :  { %3227 = vmatpush1.bf16.msra.mxu1 %v3226_v37  ;;  %3255 = vmatpush1.bf16.msra.mxu0 %v3254_v39  ;;  %v3322_v39 = vpack.c.bf16 %v1723_v28, %v1719_v27  ;;  %v3274_v44 = vpack.c.bf16 %v1753_v35, %v1749_v34  ;;  %v1794_v22 = vld [vmem:[#allocation8 + $0xb68] sm:$0xff]  ;;  %v1759_v27 = vld [vmem:[#allocation8 + $0xa50] sm:$0xff]  ;;  %v1789_v34 = vld [vmem:[#allocation8 + $0xb40] sm:$0xff] }
 0x593   :  { %3229 = vmatprep.subr.bf16.mxu1 %v3228_v40  ;;  %v1687_v40 = vld [vmem:[#allocation8 + $0x810] sm:$0xff]  ;;  %v1793_v35 = vld [vmem:[#allocation8 + $0xb60] sm:$0xff] }
 0x594   :  { %v1763_v28 = vld [vmem:[#allocation8 + $0xa70] sm:$0xff] }
 0x596   :  { %3231 = vmatpush1.bf16.msra.mxu1 %v3230_v43  ;;  %v3256_v43 = vpack.c.bf16 %v1722_v38, %v1718_v36  ;;  %v1758_v36 = vld [vmem:[#allocation8 + $0xa48] sm:$0xff] }
 0x597   :  { %3233 = vmatprep.subr.bf16.mxu1 %v3232_v46  ;;  %v1721_v46 = vld [vmem:[#allocation8 + $0x920] sm:$0xff]  ;;  %v1762_v38 = vld [vmem:[#allocation8 + $0xa68] sm:$0xff] }
 0x598   :  { %3257 = vmatprep.subr.bf16.mxu0 %v3256_v43  ;;  %v1736_v43 = vld [vmem:[#allocation8 + $0x998] sm:$0xff] }
 0x59a   :  { %3235 = vmatpush1.bf16.msra.mxu1 %v3234_v49  ;;  %v3306_v49 = vpack.c.bf16 %v1691_v41, %v1687_v40  ;;  %v1727_v41 = vld [vmem:[#allocation8 + $0x950] sm:$0xff] }
 0x59b   :  { %3237 = vmatprep.subr.bf16.mxu1 %v3236_v52  ;;  %v1695_v52 = vld [vmem:[#allocation8 + $0x850] sm:$0xff] }
 0x59c   :  { %v3310_v0 = vpack.c.bf16 %v1699_v53, %v1695_v52  ;;  %v1735_v53 = vld [vmem:[#allocation8 + $0x990] sm:$0xff] }
 0x59e   :  { %3239 = vmatpush1.bf16.msra.mxu1 %v3238_v55  ;;  %v3258_v55 = vpack.c.bf16 %v1721_v46, %v1717_v45  ;;  %v1740_v45 = vld [vmem:[#allocation8 + $0x9b8] sm:$0xff]  ;;  %v3276_v46 = vpack.c.bf16 %v1762_v38, %v1758_v36  ;;  %v1798_v36 = vld [vmem:[#allocation8 + $0xb88] sm:$0xff] }
 0x59f   :  { %3305 = vmatprep.subr.bf16.mxu1 %v3304_v4  ;;  %v1712_v4 = vld [vmem:[#allocation8 + $0x8d8] sm:$0xff]  ;;  %v3328_v52 = vpack.c.bf16 %v1740_v45, %v1736_v43  ;;  %v1802_v38 = vld [vmem:[#allocation8 + $0xba8] sm:$0xff] }
 0x5a0   :  { %3259 = vmatpush1.bf16.msra.mxu0 %v3258_v55  ;;  %v1744_v55 = vld [vmem:[#allocation8 + $0x9d8] sm:$0xff] }
 0x5a1   :  { %3261 = vmatprep.subr.bf16.mxu0 %v3260_v58  ;;  %v1776_v43 = vld [vmem:[#allocation8 + $0xad8] sm:$0xff] }
 0x5a2   :  { %v1780_v45 = vld [vmem:[#allocation8 + $0xaf8] sm:$0xff] }
 0x644   :  { %v2525_v59 = vpop.f32.mrb[16].mxu1  ;;  %v2563_v60 = vpop.f32.mrb[20].mxu0 }
 0x645   :  { %v2526_v2 = vpop.f32.mrb[17].mxu1  ;;  %v2564_v3 = vpop.f32.mrb[21].mxu0 }
 0x646   :  { %v2527_v7 = vadd.f32 %v2526_v2, %v2525_v59  ;;  %v2565_v8 = vadd.f32 %v2564_v3, %v2563_v60  ;;  %v1725_v59 = vld [vmem:[#allocation8 + $0x940] sm:$0xff]  ;;  %v1703_v2 = vld [vmem:[#allocation8 + $0x890] sm:$0xff] }
 0x647   :  { %v1729_v60 = vld [vmem:[#allocation8 + $0x960] sm:$0xff]  ;;  %v1707_v3 = vld [vmem:[#allocation8 + $0x8b0] sm:$0xff] }
 0x648   :  { %v1471_v13 = vadd.f32 %v2565_v8, %v2527_v7  ;;  %v2528_v14 = vpop.f32.mrb[18].mxu1  ;;  %v2566_v15 = vpop.f32.mrb[22].mxu0  ;;  %v3262_v5 = vpack.c.bf16 %v1729_v60, %v1725_v59  ;;  %v3264_v7 = vpack.c.bf16 %v1738_v63, %v1734_v61  ;;  %v1733_v8 = vld [vmem:[#allocation8 + $0x980] sm:$0xff]  ;;  %v3314_v12 = vpack.c.bf16 %v1707_v3, %v1703_v2  ;;  %v1774_v61 = vld [vmem:[#allocation8 + $0xac8] sm:$0xff]  ;;  %v1743_v2 = vld [vmem:[#allocation8 + $0x9d0] sm:$0xff] }
 0x649   :  { %v2529_v19 = vpop.f32.mrb[19].mxu1  ;;  %v2567_v20 = vpop.f32.mrb[23].mxu0  ;;  %v3266_v16 = vpack.c.bf16 %v1737_v9, %v1733_v8  ;;  %v1765_v59 = vld [vmem:[#allocation8 + $0xa80] sm:$0xff]  ;;  %v1778_v63 = vld [vmem:[#allocation8 + $0xae8] sm:$0xff]  ;;  %v1747_v3 = vld [vmem:[#allocation8 + $0x9f0] sm:$0xff] }
 0x64a   :  { %v4102_v23 = vmax.f32 %v1471_v13, 0.0  ;;  %v2530_v25 = vadd.f32 %v2529_v19, %v2528_v14  ;;  %v2568_v26 = vadd.f32 %v2567_v20, %v2566_v15  ;;  %v1711_v13 = vld [vmem:[#allocation8 + $0x8d0] sm:$0xff]  ;;  %v1720_v15 = vld [vmem:[#allocation8 + $0x918] sm:$0xff]  ;;  %3263 = vmatpush1.bf16.msra.mxu0 %v3262_v5  ;;  %v1741_v19 = vld [vmem:[#allocation8 + $0x9c0] sm:$0xff] }
 0x64b   :  { %v1715_v14 = vld [vmem:[#allocation8 + $0x8f0] sm:$0xff]  ;;  %3265 = vmatprep.subr.bf16.mxu0 %v3264_v7  ;;  %v1745_v20 = vld [vmem:[#allocation8 + $0x9e0] sm:$0xff]  ;;  %v3284_v7 = vpack.c.bf16 %v1778_v63, %v1774_v61 }
 0x64c   :  { %v1476_v32 = vadd.f32 %v2568_v26, %v2530_v25  ;;  %2186 = vrot.lane.b32.xlu0 %v4102_v23, %s3601_s22  ;;  %v3318_v25 = vpack.c.bf16 %v1715_v14, %v1711_v13  ;;  %v3320_v26 = vpack.c.bf16 %v1724_v17, %v1720_v15  ;;  %v3270_v30 = vpack.c.bf16 %v1745_v20, %v1741_v19  ;;  %v1769_v60 = vld [vmem:[#allocation8 + $0xaa0] sm:$0xff]  ;;  %v1751_v13 = vld [vmem:[#allocation8 + $0xa10] sm:$0xff]  ;;  %v1760_v15 = vld [vmem:[#allocation8 + $0xa58] sm:$0xff] }
 0x64d   :  { %v3282_v5 = vpack.c.bf16 %v1769_v60, %v1765_v59  ;;  %v1773_v8 = vld [vmem:[#allocation8 + $0xac0] sm:$0xff]  ;;  %v1755_v14 = vld [vmem:[#allocation8 + $0xa30] sm:$0xff]  ;;  %v1764_v17 = vld [vmem:[#allocation8 + $0xa78] sm:$0xff] }
 0x64e   :  { %v4106_v37 = vmax.f32 %v1476_v32, 0.0  ;;  %3267 = vmatpush1.bf16.msra.mxu0 %v3266_v16  ;;  %v1732_v32 = vld [vmem:[#allocation8 + $0x978] sm:$0xff]  ;;  %v1777_v9 = vld [vmem:[#allocation8 + $0xae0] sm:$0xff]  ;;  %v1783_v61 = vld [vmem:[#allocation8 + $0xb10] sm:$0xff] }
 0x64f   :  { %3269 = vmatprep.subr.bf16.mxu0 %v3268_v18  ;;  %v3324_v40 = vpack.c.bf16 %v1732_v32, %v1728_v29  ;;  %v3286_v16 = vpack.c.bf16 %v1777_v9, %v1773_v8  ;;  %v3288_v18 = vpack.c.bf16 %v1786_v11, %v1782_v10  ;;  %v1781_v19 = vld [vmem:[#allocation8 + $0xb00] sm:$0xff]  ;;  %v1768_v29 = vld [vmem:[#allocation8 + $0xa98] sm:$0xff]  ;;  %v1787_v63 = vld [vmem:[#allocation8 + $0xb30] sm:$0xff] }
 0x650   :  { %2188 = vrot.lane.b32.xlu0 %v4106_v37, %s3601_s22  ;;  %v1785_v20 = vld [vmem:[#allocation8 + $0xb20] sm:$0xff]  ;;  %v1772_v32 = vld [vmem:[#allocation8 + $0xab8] sm:$0xff]  ;;  %v1799_v10 = vld [vmem:[#allocation8 + $0xb90] sm:$0xff]  ;;  %s3538_s22 = scalar_lea.vmem %s2246_s30, 768 }
 0x651   :  { %v1803_v11 = vld [vmem:[#allocation8 + $0xbb0] sm:$0xff]  ;;  %p3539_p4 = scmp.ne.s32.totalorder %s2246_s30, %s3538_s22  ;;  %p3544_p6 = scmp.lt.s32.totalorder %s3538_s22, %s3538_s22 }
 0x652   :  { %3271 = vmatpush1.bf16.msra.mxu0 %v3270_v30  ;;  %v3290_v30 = vpack.c.bf16 %v1785_v20, %v1781_v19  ;;  %v1811_v19 = vld [vmem:[#allocation8 + $0xbf0] sm:$0xff] }
 0x653   :  { %3273 = vmatprep.subr.bf16.mxu0 %v3272_v33  ;;  %v3292_v33 = vpack.c.bf16 %v1794_v22, %v1790_v21  ;;  %v2349_v21 = vld [vmem:[%s4353_s4 + $0x480] sm:$0xff]  ;;  %v2350_v22 = vld [vmem:[%s4353_s4 + $0x488] sm:$0xff]  ;;  %p3545_p7 = por %p3544_p6, %p3543_p5 }
 0x654   :  { %v2711_v50 = vpop.f32.mrb[20].mxu1 }
 0x655   :  { %v1565_v56 = vpop.f32.mrb[21].mxu1  ;;  %p3546_p8 = pnand %p3545_p7, %p3539_p4 }
 0x656   :  { %1672 = vmatmul.mubr.f32.vlgmr.msra.gmra.mrb[22].mxu1 %v1565_v56  ;;  %3275 = vmatpush1.bf16.msra.mxu0 %v3274_v44  ;;  %v3278_v56 = vpack.c.bf16 %v1761_v48, %v1757_v47  ;;  %v3294_v44 = vpack.c.bf16 %v1793_v35, %v1789_v34  ;;  %v1797_v47 = vld [vmem:[#allocation8 + $0xb80] sm:$0xff]  ;;  %v2352_v35 = vld [vmem:[%s4353_s4 + $0x498] sm:$0xff] }
 0x657   :  { %1677 = vmatprep.mubr.f32.mxu1 %v3602_v62  ;;  %3307 = vmatpush1.bf16.msra.mxu1 %v3306_v49  ;;  %v3316_v62 = vpack.c.bf16 %v1716_v6, %v1712_v4  ;;  %v1766_v49 = vld [vmem:[#allocation8 + $0xa88] sm:$0xff]  ;;  %v1752_v4 = vld [vmem:[#allocation8 + $0xa18] sm:$0xff]  ;;  %v1801_v48 = vld [vmem:[#allocation8 + $0xba0] sm:$0xff] }
 0x658   :  { %3309 = vmatprep.subr.bf16.mxu1 %v3308_v51  ;;  %v3326_v51 = vpack.c.bf16 %v1731_v42, %v1727_v41  ;;  %3277 = vmatprep.subr.bf16.mxu0 %v3276_v46  ;;  %v1756_v6 = vld [vmem:[#allocation8 + $0xa38] sm:$0xff]  ;;  %v1767_v41 = vld [vmem:[#allocation8 + $0xa90] sm:$0xff]  ;;  %v3296_v46 = vpack.c.bf16 %v1802_v38, %v1798_v36  ;;  %v2351_v34 = vld [vmem:[%s4353_s4 + $0x490] sm:$0xff] }
 0x659   :  { %v1771_v42 = vld [vmem:[#allocation8 + $0xab0] sm:$0xff]  ;;  %v2383_v36 = vld [vmem:[%s4353_s4 + $0x590] sm:$0xff]  ;;  %v2384_v38 = vld [vmem:[%s4353_s4 + $0x598] sm:$0xff] }
 0x65a   :  { %1678 = vmatmul.mubr.f32.gmra.mrb[24].mxu1 %v2711_v50  ;;  %v1770_v50 = vld [vmem:[#allocation8 + $0xaa8] sm:$0xff]  ;;  %3279 = vmatpush1.bf16.msra.mxu0 %v3278_v56  ;;  %v1784_v56 = vld [vmem:[#allocation8 + $0xb18] sm:$0xff] }
 0x65b   :  { %3311 = vmatpush1.bf16.msra.mxu1 %v3310_v0  ;;  %v3280_v58 = vpack.c.bf16 %v1770_v50, %v1766_v49  ;;  %v3330_v0 = vpack.c.bf16 %v1739_v54, %v1735_v53  ;;  %v1806_v49 = vld [vmem:[#allocation8 + $0xbc8] sm:$0xff]  ;;  %v1775_v53 = vld [vmem:[#allocation8 + $0xad0] sm:$0xff] }
 0x65c   :  { %3313 = vmatprep.subr.bf16.mxu1 %v3312_v1  ;;  %v3332_v1 = vpack.c.bf16 %v1748_v57, %v1744_v55  ;;  %v1810_v50 = vld [vmem:[#allocation8 + $0xbe8] sm:$0xff]  ;;  %v1779_v54 = vld [vmem:[#allocation8 + $0xaf0] sm:$0xff]  ;;  %v3298_v55 = vpack.c.bf16 %v1801_v48, %v1797_v47  ;;  %v1788_v57 = vld [vmem:[#allocation8 + $0xb38] sm:$0xff] }
 0x65d   :  { %3281 = vmatprep.subr.bf16.mxu0 %v3280_v58  ;;  %v3300_v58 = vpack.c.bf16 %v1810_v50, %v1806_v49  ;;  %v3350_v59 = vpack.c.bf16 %v1779_v54, %v1775_v53  ;;  %v3352_v60 = vpack.c.bf16 %v1788_v57, %v1784_v56  ;;  %v2367_v47 = vld [vmem:[%s4353_s4 + $0x510] sm:$0xff]  ;;  %v2368_v48 = vld [vmem:[%s4353_s4 + $0x518] sm:$0xff]  ;;  %v2353_v49 = vld [vmem:[%s4353_s4 + $0x4a0] sm:$0xff] }
 0x65e   :  { %3283 = vmatpush1.bf16.msra.mxu0 %v3282_v5  ;;  %v1795_v5 = vld [vmem:[#allocation8 + $0xb70] sm:$0xff]  ;;  %v2354_v50 = vld [vmem:[%s4353_s4 + $0x4a8] sm:$0xff] }
 0x65f   :  { %3315 = vmatpush1.bf16.msra.mxu1 %v3314_v12  ;;  %v3334_v12 = vpack.c.bf16 %v1747_v3, %v1743_v2  ;;  %3285 = vmatprep.subr.bf16.mxu0 %v3284_v7  ;;  %v3354_v2 = vpack.c.bf16 %v1787_v63, %v1783_v61  ;;  %v1804_v7 = vld [vmem:[#allocation8 + $0xbb8] sm:$0xff]  ;;  %v2337_v56 = vld [vmem:[%s4353_s4 + $0x420] sm:$0xff] }
 0x660   :  { %3317 = vmatprep.subr.bf16.mxu1 %v3316_v62  ;;  %v3336_v62 = vpack.c.bf16 %v1756_v6, %v1752_v4  ;;  %v1791_v4 = vld [vmem:[#allocation8 + $0xb50] sm:$0xff]  ;;  %v1800_v6 = vld [vmem:[#allocation8 + $0xb98] sm:$0xff] }
 0x661   :  { %v3358_v8 = vpack.c.bf16 %v1795_v5, %v1791_v4  ;;  %v3360_v9 = vpack.c.bf16 %v1804_v7, %v1800_v6  ;;  %v2338_v57 = vld [vmem:[%s4353_s4 + $0x428] sm:$0xff]  ;;  %v2369_v61 = vld [vmem:[%s4353_s4 + $0x520] sm:$0xff]  ;;  %v2339_v6 = vld [vmem:[%s4353_s4 + $0x430] sm:$0xff] }
 0x662   :  { %3287 = vmatpush1.bf16.msra.mxu0 %v3286_v16  ;;  %v1809_v16 = vld [vmem:[#allocation8 + $0xbe0] sm:$0xff]  ;;  %v2370_v63 = vld [vmem:[%s4353_s4 + $0x528] sm:$0xff]  ;;  %v3378_v4 = vpack.c.bf16 %v2338_v57, %v2337_v56  ;;  %v2340_v7 = vld [vmem:[%s4353_s4 + $0x438] sm:$0xff] }
 0x663   :  { %3319 = vmatpush1.bf16.msra.mxu1 %v3318_v25  ;;  %v3338_v25 = vpack.c.bf16 %v1755_v14, %v1751_v13  ;;  %3289 = vmatprep.subr.bf16.mxu0 %v3288_v18  ;;  %v3362_v13 = vpack.c.bf16 %v1803_v11, %v1799_v10  ;;  %v3410_v5 = vpack.c.bf16 %v2370_v63, %v2369_v61  ;;  %v2371_v10 = vld [vmem:[%s4353_s4 + $0x530] sm:$0xff]  ;;  %v2372_v11 = vld [vmem:[%s4353_s4 + $0x538] sm:$0xff] }
 0x664   :  { %3321 = vmatprep.subr.bf16.mxu1 %v3320_v26  ;;  %v3340_v26 = vpack.c.bf16 %v1764_v17, %v1760_v15  ;;  %v1805_v15 = vld [vmem:[#allocation8 + $0xbc0] sm:$0xff]  ;;  %v1807_v17 = vld [vmem:[#allocation8 + $0xbd0] sm:$0xff] }
 0x665   :  { %v3302_v18 = vpack.c.bf16 %v1809_v16, %v1805_v15  ;;  %v3366_v20 = vpack.c.bf16 %v1811_v19, %v1807_v17  ;;  %v3382_v15 = vpack.c.bf16 %v2340_v7, %v2339_v6  ;;  %v3414_v16 = vpack.c.bf16 %v2372_v11, %v2371_v10  ;;  %v2341_v17 = vld [vmem:[%s4353_s4 + $0x440] sm:$0xff]  ;;  %v2379_v61 = vld [vmem:[%s4353_s4 + $0x570] sm:$0xff] }
 0x666   :  { %3291 = vmatpush1.bf16.msra.mxu0 %v3290_v30  ;;  %v2334_v30 = vld [vmem:[%s4353_s4 + $0x408] sm:$0xff] }
 0x667   :  { %3323 = vmatpush1.bf16.msra.mxu1 %v3322_v39  ;;  %v3342_v39 = vpack.c.bf16 %v1763_v28, %v1759_v27  ;;  %3293 = vmatprep.subr.bf16.mxu0 %v3292_v33  ;;  %v2382_v27 = vld [vmem:[%s4353_s4 + $0x588] sm:$0xff] }
 0x668   :  { %3325 = vmatprep.subr.bf16.mxu1 %v3324_v40  ;;  %v3344_v40 = vpack.c.bf16 %v1772_v32, %v1768_v29  ;;  %v2333_v29 = vld [vmem:[%s4353_s4 + $0x400] sm:$0xff]  ;;  %v2366_v33 = vld [vmem:[%s4353_s4 + $0x508] sm:$0xff] }
 0x669   :  { %v2365_v32 = vld [vmem:[%s4353_s4 + $0x500] sm:$0xff] }
 0x66a   :  { %3295 = vmatpush1.bf16.msra.mxu0 %v3294_v44 }
 0x66b   :  { %3327 = vmatpush1.bf16.msra.mxu1 %v3326_v51  ;;  %v3346_v51 = vpack.c.bf16 %v1771_v42, %v1767_v41  ;;  %3297 = vmatprep.subr.bf16.mxu0 %v3296_v46  ;;  %v3402_v41 = vpack.c.bf16 %v2366_v33, %v2365_v32  ;;  %v2335_v42 = vld [vmem:[%s4353_s4 + $0x410] sm:$0xff]  ;;  %v3404_v46 = vpack.c.bf16 %v2384_v38, %v2383_v36  ;;  %v2344_v33 = vld [vmem:[%s4353_s4 + $0x458] sm:$0xff] }
 0x66c   :  { %3329 = vmatprep.subr.bf16.mxu1 %v3328_v52  ;;  %v3348_v52 = vpack.c.bf16 %v1780_v45, %v1776_v43  ;;  %v2336_v43 = vld [vmem:[%s4353_s4 + $0x418] sm:$0xff]  ;;  %v3372_v45 = vpack.c.bf16 %v2352_v35, %v2351_v34  ;;  %v2343_v32 = vld [vmem:[%s4353_s4 + $0x450] sm:$0xff] }
 0x66d   :  { %v3374_v54 = vpack.c.bf16 %v2336_v43, %v2335_v42  ;;  %v2375_v36 = vld [vmem:[%s4353_s4 + $0x550] sm:$0xff]  ;;  %v2376_v38 = vld [vmem:[%s4353_s4 + $0x558] sm:$0xff]  ;;  %v2394_v42 = vld [vmem:[%s4353_s4 + $0x5e8] sm:$0xff]  ;;  %v3390_v43 = vpack.c.bf16 %v2344_v33, %v2343_v32 }
 0x66e   :  { %3299 = vmatpush1.bf16.msra.mxu0 %v3298_v55  ;;  %v3406_v55 = vpack.c.bf16 %v2368_v48, %v2367_v47 }
 0x66f   :  { %3331 = vmatpush1.bf16.msra.mxu1 %v3330_v0  ;;  %v1792_v0 = vld [vmem:[#allocation8 + $0xb58] sm:$0xff]  ;;  %3301 = vmatprep.subr.bf16.mxu0 %v3300_v58 }
 0x670   :  { %3333 = vmatprep.subr.bf16.mxu1 %v3332_v1  ;;  %v1796_v1 = vld [vmem:[#allocation8 + $0xb78] sm:$0xff] }
 0x671   :  { %v3356_v3 = vpack.c.bf16 %v1796_v1, %v1792_v0  ;;  %v2355_v0 = vld [vmem:[%s4353_s4 + $0x4b0] sm:$0xff]  ;;  %v2356_v1 = vld [vmem:[%s4353_s4 + $0x4b8] sm:$0xff] }
 0x672   :  { %3303 = vmatpush1.bf16.msra.mxu0 %v3302_v18  ;;  %v2342_v18 = vld [vmem:[%s4353_s4 + $0x448] sm:$0xff] }
 0x673   :  { %3335 = vmatpush1.bf16.msra.mxu1 %v3334_v12  ;;  %v1808_v12 = vld [vmem:[#allocation8 + $0xbd8] sm:$0xff] }
 0x674   :  { %3337 = vmatprep.subr.bf16.mxu1 %v3336_v62  ;;  %v1812_v62 = vld [vmem:[#allocation8 + $0xbf8] sm:$0xff] }
 0x675   :  { %v3364_v14 = vpack.c.bf16 %v1812_v62, %v1808_v12  ;;  %v2357_v12 = vld [vmem:[%s4353_s4 + $0x4c0] sm:$0xff]  ;;  %v2358_v62 = vld [vmem:[%s4353_s4 + $0x4c8] sm:$0xff] }
 0x676   :  { %v3384_v19 = vpack.c.bf16 %v2358_v62, %v2357_v12 }
 0x677   :  { %3339 = vmatpush1.bf16.msra.mxu1 %v3338_v25  ;;  %v2381_v25 = vld [vmem:[%s4353_s4 + $0x580] sm:$0xff] }
 0x678   :  { %3341 = vmatprep.subr.bf16.mxu1 %v3340_v26  ;;  %v3368_v26 = vpack.c.bf16 %v2350_v22, %v2349_v21  ;;  %v3400_v28 = vpack.c.bf16 %v2382_v27, %v2381_v25  ;;  %v2373_v21 = vld [vmem:[%s4353_s4 + $0x540] sm:$0xff]  ;;  %v2374_v22 = vld [vmem:[%s4353_s4 + $0x548] sm:$0xff]  ;;  %v2359_v25 = vld [vmem:[%s4353_s4 + $0x4d0] sm:$0xff] }
 0x679   :  { %v2391_v27 = vld [vmem:[%s4353_s4 + $0x5d0] sm:$0xff] }
 0x67a   :  { %3369 = vmatprep.subr.bf16.mxu0 %v3368_v26  ;;  %v2360_v26 = vld [vmem:[%s4353_s4 + $0x4d8] sm:$0xff] }
 0x67b   :  { %3343 = vmatpush1.bf16.msra.mxu1 %v3342_v39  ;;  %v3388_v34 = vpack.c.bf16 %v2360_v26, %v2359_v25 }
 0x67c   :  { %3345 = vmatprep.subr.bf16.mxu1 %v3344_v40  ;;  %v3370_v40 = vpack.c.bf16 %v2334_v30, %v2333_v29  ;;  %v3386_v29 = vpack.c.bf16 %v2342_v18, %v2341_v17  ;;  %v3418_v30 = vpack.c.bf16 %v2374_v22, %v2373_v21 }
 0x67f   :  { %3347 = vmatpush1.bf16.msra.mxu1 %v3346_v51  ;;  %v2385_v51 = vld [vmem:[%s4353_s4 + $0x5a0] sm:$0xff] }
 0x680   :  { %3349 = vmatprep.subr.bf16.mxu1 %v3348_v52  ;;  %v2386_v52 = vld [vmem:[%s4353_s4 + $0x5a8] sm:$0xff] }
 0x683   :  { %3351 = vmatpush1.bf16.msra.mxu1 %v3350_v59  ;;  %v3376_v59 = vpack.c.bf16 %v2354_v50, %v2353_v49  ;;  %v2377_v49 = vld [vmem:[%s4353_s4 + $0x560] sm:$0xff]  ;;  %v2378_v50 = vld [vmem:[%s4353_s4 + $0x568] sm:$0xff] }
 0x684   :  { %3353 = vmatprep.subr.bf16.mxu1 %v3352_v60  ;;  %v3408_v60 = vpack.c.bf16 %v2386_v52, %v2385_v51  ;;  %v2363_v51 = vld [vmem:[%s4353_s4 + $0x4f0] sm:$0xff]  ;;  %v2364_v52 = vld [vmem:[%s4353_s4 + $0x4f8] sm:$0xff]  ;;  %v3426_v56 = vpack.c.bf16 %v2378_v50, %v2377_v49 }
 0x685   :  { %v3396_v57 = vpack.c.bf16 %v2364_v52, %v2363_v51 }
 0x687   :  { %3355 = vmatpush1.bf16.msra.mxu1 %v3354_v2  ;;  %v2387_v2 = vld [vmem:[%s4353_s4 + $0x5b0] sm:$0xff] }
 0x688   :  { %3357 = vmatprep.subr.bf16.mxu1 %v3356_v3  ;;  %v2388_v3 = vld [vmem:[%s4353_s4 + $0x5b8] sm:$0xff] }
 0x68b   :  { %3359 = vmatpush1.bf16.msra.mxu1 %v3358_v8  ;;  %v3380_v8 = vpack.c.bf16 %v2356_v1, %v2355_v0  ;;  %v2380_v0 = vld [vmem:[%s4353_s4 + $0x578] sm:$0xff] }
 0x68c   :  { %3361 = vmatprep.subr.bf16.mxu1 %v3360_v9  ;;  %v3412_v9 = vpack.c.bf16 %v2388_v3, %v2387_v2  ;;  %v3430_v1 = vpack.c.bf16 %v2380_v0, %v2379_v61 }
 0x68f   :  { %3363 = vmatpush1.bf16.msra.mxu1 %v3362_v13  ;;  %v2389_v13 = vld [vmem:[%s4353_s4 + $0x5c0] sm:$0xff] }
 0x690   :  { %3365 = vmatprep.subr.bf16.mxu1 %v3364_v14  ;;  %v2390_v14 = vld [vmem:[%s4353_s4 + $0x5c8] sm:$0xff] }
 0x693   :  { %3367 = vmatpush1.bf16.msra.mxu1 %v3366_v20  ;;  %v3416_v20 = vpack.c.bf16 %v2390_v14, %v2389_v13 }
 0x694   :  { %3401 = vmatprep.subr.bf16.mxu1 %v3400_v28  ;;  %v2392_v28 = vld [vmem:[%s4353_s4 + $0x5d8] sm:$0xff] }
 0x695   :  { %v3420_v35 = vpack.c.bf16 %v2392_v28, %v2391_v27  ;;  %v777_v27 = vmax.f32 %v3904_v31, 0.0 }
 0x729   :  { %v1673_v39 = vpop.f32.mrb[22].mxu1 }
 0x72a   :  { %v1675_v44 = vpop.f32.mrb[23].mxu1 }
 0x72b   :  { %1877 = vmatprep.mubr.f32.mxu0 %v1675_v44  ;;  %1954 = vmatprep.mubr.f32.mxu1 %v1675_v44  ;;  %v3422_v44 = vpack.c.bf16 %v2376_v38, %v2375_v36 }
 0x72c   :  { %1878 = vmatmul.mubr.f32.vlgmr.msra.gmra.mrb[24].mxu0 %v1673_v39  ;;  %1955 = vmatmul.mubr.f32.vlgmr.msra.gmra.mrb[26].mxu1 %v1673_v39  ;;  %v2361_v39 = vld [vmem:[%s4353_s4 + $0x4e0] sm:$0xff] }
 0x72d   :  { %v1679_v53 = vpop.f32.mrb[24].mxu1  ;;  %3371 = vmatpush3.bf16.msra.mxu0 %v3370_v40  ;;  %3403 = vmatpush3.bf16.msra.mxu1 %v3402_v41  ;;  %v2362_v40 = vld [vmem:[%s4353_s4 + $0x4e8] sm:$0xff]  ;;  %v2393_v41 = vld [vmem:[%s4353_s4 + $0x5e0] sm:$0xff] }
 0x72e   :  { %v1681_v58 = vpop.f32.mrb[25].mxu1  ;;  %3373 = vmatprep.subr.bf16.mxu0 %v3372_v45  ;;  %3405 = vmatprep.subr.bf16.mxu1 %v3404_v46  ;;  %v2345_v45 = vld [vmem:[%s4353_s4 + $0x460] sm:$0xff]  ;;  %v2346_v46 = vld [vmem:[%s4353_s4 + $0x468] sm:$0xff]  ;;  %v3392_v47 = vpack.c.bf16 %v2362_v40, %v2361_v39  ;;  %v3424_v48 = vpack.c.bf16 %v2394_v42, %v2393_v41 }
 0x72f   :  { %1883 = vmatprep.mubr.f32.mxu0 %v1681_v58  ;;  %1960 = vmatprep.mubr.f32.mxu1 %v1681_v58 }
 0x730   :  { %1884 = vmatmul.mubr.f32.gmra.mrb[26].mxu0 %v1679_v53  ;;  %1961 = vmatmul.mubr.f32.gmra.mrb[28].mxu1 %v1679_v53  ;;  %v2395_v53 = vld [vmem:[%s4353_s4 + $0x5f0] sm:$0xff] }
 0x731   :  { %3375 = vmatpush3.bf16.msra.mxu0 %v3374_v54  ;;  %3407 = vmatpush3.bf16.msra.mxu1 %v3406_v55  ;;  %v2396_v54 = vld [vmem:[%s4353_s4 + $0x5f8] sm:$0xff]  ;;  %v3394_v55 = vpack.c.bf16 %v2346_v46, %v2345_v45 }
 0x732   :  { %3377 = vmatprep.subr.bf16.mxu0 %v3376_v59  ;;  %3409 = vmatprep.subr.bf16.mxu1 %v3408_v60  ;;  %v3428_v58 = vpack.c.bf16 %v2396_v54, %v2395_v53  ;;  %v2347_v59 = vld [vmem:[%s4353_s4 + $0x470] sm:$0xff]  ;;  %v2348_v60 = vld [vmem:[%s4353_s4 + $0x478] sm:$0xff]  ;;  %s3603_s4 = smov 64  }
 0x733   :  { %v3398_v63 = vpack.c.bf16 %v2348_v60, %v2347_v59 }
 0x735   :  { %3379 = vmatpush3.bf16.msra.mxu0 %v3378_v4  ;;  %3411 = vmatpush3.bf16.msra.mxu1 %v3410_v5 }
 0x736   :  { %3381 = vmatprep.subr.bf16.mxu0 %v3380_v8  ;;  %3413 = vmatprep.subr.bf16.mxu1 %v3412_v9 }
 0x739   :  { %3383 = vmatpush3.bf16.msra.mxu0 %v3382_v15  ;;  %3415 = vmatpush3.bf16.msra.mxu1 %v3414_v16  ;;  %v776_v15 = vmax.f32 %v3902_v24, 0.0 }
 0x73a   :  { %3385 = vmatprep.subr.bf16.mxu0 %v3384_v19  ;;  %3417 = vmatprep.subr.bf16.mxu1 %v3416_v20 }
 0x73b   :  { %v2208_v21 = vadd.f32 %v4102_v23, %v776_v15 }
 0x73d   :  { %3387 = vmatpush3.bf16.msra.mxu0 %v3386_v29  ;;  %3419 = vmatpush3.bf16.msra.mxu1 %v3418_v30  ;;  %v2209_v30 = vadd.f32 %v4106_v37, %v777_v27 }
 0x73e   :  { %3389 = vmatprep.subr.bf16.mxu0 %v3388_v34  ;;  %3421 = vmatprep.subr.bf16.mxu1 %v3420_v35 }
 0x741   :  { %3391 = vmatpush3.bf16.msra.mxu0 %v3390_v43  ;;  %3423 = vmatpush3.bf16.msra.mxu1 %v3422_v44 }
 0x742   :  { %3393 = vmatprep.subr.bf16.mxu0 %v3392_v47  ;;  %3425 = vmatprep.subr.bf16.mxu1 %v3424_v48 }
 0x745   :  { %3395 = vmatpush3.bf16.msra.mxu0 %v3394_v55  ;;  %3427 = vmatpush3.bf16.msra.mxu1 %v3426_v56 }
 0x746   :  { %3397 = vmatprep.subr.bf16.mxu0 %v3396_v57  ;;  %3429 = vmatprep.subr.bf16.mxu1 %v3428_v58 }
 0x749   :  { %3399 = vmatpush3.bf16.msra.mxu0 %v3398_v63  ;;  %3431 = vmatpush3.bf16.msra.mxu1 %v3430_v1 }
 0x7ff   :  { %v1879_v2 = vpop.f32.mrb[24].mxu0  ;;  %v1956_v3 = vpop.f32.mrb[26].mxu1 }
 0x800   :  { %v1881_v4 = vpop.f32.mrb[25].mxu0  ;;  %v1958_v5 = vpop.f32.mrb[27].mxu1 }
 0x801   :  { %2096 = vmatprep.mubr.f32.mxu0 %v1881_v4  ;;  %2171 = vmatprep.mubr.f32.mxu1 %v1958_v5 }
 0x802   :  { %2097 = vmatmul.mubr.f32.vlgmr.msra.gmra.mrb[28].mxu0 %v1879_v2  ;;  %2172 = vmatmul.mubr.f32.vlgmr.msra.gmra.mrb[30].mxu1 %v1956_v3 }
 0x803   :  { %v1885_v6 = vpop.f32.mrb[26].mxu0  ;;  %v1962_v7 = vpop.f32.mrb[28].mxu1 }
 0x804   :  { %v1887_v8 = vpop.f32.mrb[27].mxu0  ;;  %v1964_v9 = vpop.f32.mrb[29].mxu1 }
 0x805   :  { %2101 = vmatprep.mubr.f32.mxu0 %v1887_v8  ;;  %2176 = vmatprep.mubr.f32.mxu1 %v1964_v9 }
 0x806   :  { %2102 = vmatmul.mubr.f32.gmra.mrb[30].mxu0 %v1885_v6  ;;  %2177 = vmatmul.mubr.f32.gmra.mrb[32].mxu1 %v1962_v7 }
 0x8d5   :  { %v2611_v10 = vpop.f32.mrb[28].mxu0  ;;  %v2649_v11 = vpop.f32.mrb[30].mxu1 }
 0x8d6   :  { %v2612_v12 = vpop.f32.mrb[29].mxu0  ;;  %v2650_v62 = vpop.f32.mrb[31].mxu1 }
 0x8d7   :  { %v2613_v13 = vadd.f32 %v2612_v12, %v2611_v10  ;;  %v2651_v14 = vadd.f32 %v2650_v62, %v2649_v11 }
 0x8d9   :  { %v2174_v16 = vadd.f32 %v2651_v14, %v2613_v13  ;;  %v2614_v17 = vpop.f32.mrb[30].mxu0  ;;  %v2652_v18 = vpop.f32.mrb[32].mxu1 }
 0x8da   :  { %v2615_v19 = vpop.f32.mrb[31].mxu0  ;;  %v2653_v20 = vpop.f32.mrb[33].mxu1 }
 0x8db   :  { %v2182_v22 = vmax.f32 %v2174_v16, 0.0  ;;  %v2616_v25 = vadd.f32 %v2615_v19, %v2614_v17  ;;  %v2654_v26 = vadd.f32 %v2653_v20, %v2652_v18 }
 0x8dd   :  { %v2210_v28 = vadd.f32 %v2208_v21, %v2182_v22  ;;  %v2179_v29 = vadd.f32 %v2654_v26, %v2616_v25  ;;  %2194 = vrot.lane.b32.xlu1 %v2182_v22, %s3603_s4 }
 0x8df   :  { %3446 = vrcp.f32 %v2210_v28  ;;  %v2183_v24 = vmax.f32 %v2179_v29, 0.0 }
 0x8e1   :  { %v2211_v32 = vadd.f32 %v2209_v30, %v2183_v24  ;;  %2196 = vrot.lane.b32.xlu1 %v2183_v24, %s3603_s4 }
 0x8e3   :  { %3448 = vrcp.f32 %v2211_v32 }
 0x8e9   :  { %v3447_v33 = vpop.eup %3446 }
 0x8ea   :  { %v2223_v34 = vmul.f32 %v3447_v33, %v2182_v22  ;;  %v2213_v35 = vmul.f32 %v3447_v33, %v776_v15  ;;  %v2218_v36 = vmul.f32 %v3447_v33, %v4102_v23 }
 0x8ec   :  { %2226 = vst.msk [vmem:[#allocation11 + $0x20] sm:$0xff] %vm2200_vm1, %v2223_v34  ;;  %2216 = vst.msk [vmem:[#allocation11] sm:$0xff] %vm2200_vm1, %v2213_v35 }
 0x8ed   :  { %2221 = vst.msk [vmem:[#allocation11 + $0x10] sm:$0xff] %vm2200_vm1, %v2218_v36  ;;  %v3449_v31 = vpop.eup %3448 }
 0x8ee   :  { %v2224_v38 = vmul.f32 %v3449_v31, %v2183_v24  ;;  %v2215_v39 = vmul.f32 %v3449_v31, %v777_v27  ;;  %v2219_v40 = vmul.f32 %v3449_v31, %v4106_v37 }
 0x8f0   :  { %2227 = vst.msk [vmem:[#allocation11 + $0x28] sm:$0xff] %vm2200_vm1, %v2224_v38  ;;  %2217 = vst.msk [vmem:[#allocation11 + $0x8] sm:$0xff] %vm2200_vm1, %v2215_v39 }
 0x8f1   :  { %2222 = vst.msk [vmem:[#allocation11 + $0x18] sm:$0xff] %vm2200_vm1, %v2219_v40 }
 0x8f2   :  { %3549 = shalt.err (!%p3546_p8)
}
 0x8f3   :  { %s3550_s0 = scalar_lea.hbm %s4355_s6, 768 }
 0x8f4   :  { %p3551_p9 = scmp.ne.s32.totalorder %s4355_s6, %s3550_s0  ;;  %p3554_p10 = scmp.lt.u32.totalorder %s3550_s0, %s4355_s6 }
 0x8f6   :  { %p3556_p11 = pnand %p3554_p10, %p3551_p9 }
 0x8f8   :  { %3559 = shalt.err (!%p3556_p11)
}
 0x8f9   :  { %2251 = dma.vmem_to_hbm [thread:$0]  %s2246_s30, 768, %s4355_s6, [#allocation12], %s3594_s9, %s3594_s9, %s3595_s10   ;;  %v2187_v23 = vpop.permute.xlu0 %2186  ;;  %vm2205_vm2 = vcmask 785408  }
 0x8fa   :  { %v2201_v37 = vsel %vm2200_vm1, %v776_v15, %v2187_v23  ;;  %s3605_s16 = smov [#allocation10]  }
 0x8fb   :  { %s2233_s17 = sshll.u32 %s3605_s16, 4  ;;  %s2234_s17 = int_to_ptr.vmem [resolvable:$true] %s2233_s17 }
 0x8fc   :  { %s3560_s18 = scalar_lea.vmem %s2234_s17, 256  ;;  %p3565_p13 = scmp.lt.s32.totalorder %s2234_s17, %s2234_s17 }
 0x8fd   :  { %v2189_v42 = vpop.permute.xlu0 %2188  ;;  %p3561_p12 = scmp.ne.s32.totalorder %s2234_s17, %s3560_s18  ;;  %p3566_p0 = scmp.lt.s32.totalorder %s3560_s18, %s3560_s18 }
 0x8fe   :  { %v2202_v44 = vsel %vm2200_vm1, %v777_v27, %v2189_v42 }
 0x8ff   :  { %p3567_p1 = por %p3566_p0, %p3565_p13 }
 0x901   :  { %p3568_p2 = pnand %p3567_p1, %p3561_p12 }
 0x94f   :  { %v2195_v41 = vpop.permute.xlu1 %2194 }
 0x950   :  { %v2203_v43 = vsel %vm89_vm0, %v2201_v37, %v2195_v41 }
 0x951   :  { %2206 = vst.msk [vmem:[#allocation10] sm:$0xff] %vm2205_vm2, %v2203_v43 }
 0x953   :  { %v2197_v45 = vpop.permute.xlu1 %2196 }
 0x954   :  { %v2204_v46 = vsel %vm89_vm0, %v2202_v44, %v2197_v45 }
 0x955   :  { %2207 = vst.msk [vmem:[#allocation10 + $0x8] sm:$0xff] %vm2205_vm2, %v2204_v46 }
 0x956   :  { %3571 = shalt.err (!%p3568_p2)
}
 0x957   :  { %s3572_s20 = scalar_lea.hbm %s4354_s5, 256 }
 0x958   :  { %p3573_p3 = scmp.ne.s32.totalorder %s4354_s5, %s3572_s20  ;;  %p3576_p4 = scmp.lt.u32.totalorder %s3572_s20, %s4354_s5 }
 0x95a   :  { %p3578_p5 = pnand %p3576_p4, %p3573_p3 }
 0x95c   :  { %3581 = shalt.err (!%p3578_p5)
}
 0x95d   :  { %2239 = dma.vmem_to_hbm [thread:$0]  %s2234_s17, 256, %s4354_s5, [#allocation4], %s3594_s9, %s3594_s9, %s3595_s10  }
 0x95e   :  { %3588 = dma.done.wait [#allocation4], 256  }
 0x95f   :  { %3589 = vsyncadd [#allocation4], 4294967040 }
 0x960   :  { %3590 = dma.done.wait [#allocation12], 768  }
 0x961   :  { %3591 = vsyncadd [#allocation12], 4294966528 }
 0x962   :  { %2258 = vsyncpa [#allocation3], 1 }
 0x963   :  { %2259 = vsyncpa [#allocation6], 1 }
 0x964   :  { %2260 = vsyncpa [#allocation9], 1 }
 0x965   :  { %2261 = vsyncpa [#allocation4], 1 }
 0x966   :  { %2262 = vsyncpa [#allocation12], 1 }

</bundles_post_ra>
